<compile_context>
chip_gen: v7x
topology: tpu7x:2x2x1
jax: 0.10.0
libtpu: 0.0.40
codegen_flags: <defaults>
</compile_context>

<pallas_src>
import math

import numpy as np
import jax
import jax.numpy as jnp
from jax.experimental import pallas as pl
from jax.experimental.pallas import tpu as pltpu


def _round_up(x: int, m: int) -> int:
    return ((x + m - 1) // m) * m


# ----------------------------------------------------------------------------
# Filter construction (deterministic, mirrors kaiser_sinc_filter1d)
# ----------------------------------------------------------------------------
def kaiser_sinc_filter1d(cutoff: float, half_width: float, kernel_size: int) -> np.ndarray:
    even = kernel_size % 2 == 0
    half_size = kernel_size // 2
    delta_f = 4 * half_width
    A = 2.285 * (half_size - 1) * math.pi * delta_f + 7.95
    if A > 50.0:
        beta = 0.1102 * (A - 8.7)
    elif A >= 21.0:
        beta = 0.5842 * (A - 21.0) ** 0.4 + 0.07886 * (A - 21.0)
    else:
        beta = 0.0
    window = np.kaiser(kernel_size, beta)  # symmetric == torch periodic=False
    if even:
        time = np.arange(-half_size, half_size) + 0.5
    else:
        time = np.arange(kernel_size) - half_size
    if cutoff == 0:
        return np.zeros((1, 1, kernel_size), dtype=np.float32)
    filt = 2.0 * cutoff * window * np.sinc(2.0 * cutoff * time)
    filt = filt / filt.sum()
    return filt.reshape(1, 1, kernel_size).astype(np.float32)


# ----------------------------------------------------------------------------
# Pallas kernel: per-tile banded matmul (main band + halo band)
# ----------------------------------------------------------------------------
def _banded_dwconv_kernel(a_ref, h_ref, wm_ref, wh_ref, o_ref):
    # a_ref : (TR, TN*ratio)   main input window for this output tile
    # h_ref : (TR, 128)        halo columns (next 128 input columns)
    # wm_ref: (TN*ratio, TN)   banded filter matrix, main part (grid-constant)
    # wh_ref: (128, TN)        banded filter matrix, halo part (grid-constant)
    # o_ref : (TR, TN)
    acc = jnp.dot(a_ref[...], wm_ref[...], preferred_element_type=jnp.float32)
    acc = acc + jnp.dot(h_ref[...], wh_ref[...], preferred_element_type=jnp.float32)
    o_ref[...] = acc.astype(o_ref.dtype)


class DownSample1d:
    """JAX/Pallas port of the PyTorch DownSample1d module."""

    _HALO_W = 128          # halo block width (lane-aligned)
    _MAX_ROW_TILE = 256    # rows (B*C) per tile

    def __init__(self, ratio: int = 2, kernel_size: int = None):
        self.ratio = ratio
        self.kernel_size = int(6 * ratio // 2) * 2 if kernel_size is None else kernel_size
        even = self.kernel_size % 2 == 0
        self.pad_left = self.kernel_size // 2 - int(even)
        self.pad_right = self.kernel_size // 2
        filt = kaiser_sinc_filter1d(
            cutoff=0.5 / ratio, half_width=0.6 / ratio, kernel_size=self.kernel_size
        )
        self.downsample_filter = filt[0, 0]  # (K,)

        K = self.kernel_size
        assert K - ratio <= self._HALO_W, "kernel band wider than halo block"

        # Output-column tile width: lane-dense (multiple of 128), sized so the
        # main band (TN*ratio, TN) stays a few MiB at most (fits v7x VMEM).
        tn = max(128, min(512, (2048 // max(ratio, 1)) // 128 * 128))
        self.tile_n = tn
        W = tn * ratio

        # Banded filter matrix, built ONCE here (hoisted out of __call__).
        #   Wfull[t*ratio + k, t] = f[k]   for t in [0, TN), k in [0, K)
        f = np.asarray(self.downsample_filter, dtype=np.float32)
        Wfull = np.zeros((W + self._HALO_W, tn), dtype=np.float32)
        t_idx = np.arange(tn)
        for k in range(K):
            Wfull[t_idx * ratio + k, t_idx] = f[k]
        self.w_main = jnp.asarray(Wfull[:W])               # (TN*ratio, TN)
        self.w_halo = jnp.asarray(Wfull[W:W + self._HALO_W])  # (128, TN)

    def __call__(self, x: jnp.ndarray) -> jnp.ndarray:
        # x: (B, C, T) float32 (PyTorch NCL convention)
        B, C, T = x.shape
        K = self.kernel_size
        ratio = self.ratio
        TN = self.tile_n
        HALO = self._HALO_W
        W = TN * ratio

        T_pad = T + self.pad_left + self.pad_right
        L_out = (T_pad - K) // ratio + 1

        # --- tiling / padded extents -------------------------------------
        R = B * C
        TR = min(self._MAX_ROW_TILE, _round_up(R, 8))
        R_pad = _round_up(R, TR)

        L_out_pad = _round_up(max(L_out, 1), TN)
        # input columns needed: main blocks up to L_out_pad*ratio, plus one
        # halo block; round up so both block widths divide the extent.
        T_in_pad = _round_up(L_out_pad * ratio + HALO, W)

        # --- glue: replicate pad + alignment pad in ONE jnp.pad -----------
        # (extra rows / trailing columns only feed outputs that get sliced off)
        x2d = x.reshape(R, T).astype(jnp.float32)
        x2d = jnp.pad(
            x2d,
            ((0, R_pad - R), (self.pad_left, T_in_pad - T - self.pad_left)),
            mode="edge",
        )

        n_row_tiles = R_pad // TR
        n_col_tiles = L_out_pad // TN
        halo_stride = W // HALO  # main-block width in units of halo blocks

        out2d = pl.pallas_call(
            _banded_dwconv_kernel,
            out_shape=jax.ShapeDtypeStruct((R_pad, L_out_pad), jnp.float32),
            grid_spec=pltpu.PrefetchScalarGridSpec(
                num_scalar_prefetch=0,
                grid=(n_row_tiles, n_col_tiles),
                in_specs=[
                    # main input window for output-column tile j
                    pl.BlockSpec((TR, W), lambda i, j: (i, j)),
                    # halo: next 128 input columns after the main window
                    pl.BlockSpec((TR, HALO),
                                 lambda i, j: (i, (j + 1) * halo_stride)),
                    # banded filter (grid-constant -> stays resident in VMEM)
                    pl.BlockSpec((W, TN), lambda i, j: (0, 0)),
                    pl.BlockSpec((HALO, TN), lambda i, j: (0, 0)),
                ],
                out_specs=pl.BlockSpec((TR, TN), lambda i, j: (i, j)),
            ),
            compiler_params=pltpu.CompilerParams(
                dimension_semantics=("parallel", "parallel"),
                vmem_limit_bytes=32 * 1024 * 1024,
            ),
        )(x2d, x2d, self.w_main, self.w_halo)

        return out2d[:R, :L_out].reshape(B, C, L_out)


# ----------------------------------------------------------------------------
# Reference (pure numpy) for a sanity check
# ----------------------------------------------------------------------------
def _reference_downsample1d(x, filt, ratio, pad_left, pad_right):
    x = np.asarray(x)
    B, C, T = x.shape
    xp = np.pad(x, ((0, 0), (0, 0), (pad_left, pad_right)), mode="edge")
    K = filt.shape[0]
    L_out = (xp.shape[-1] - K) // ratio + 1
    out = np.zeros((B, C, L_out), dtype=np.float32)
    for t in range(L_out):
        out[:, :, t] = np.einsum("bck,k->bc", xp[:, :, t * ratio : t * ratio + K], filt)
    return out


if __name__ == "__main__":
    B, C, T = 2, 4, 16
    ratio, kernel_size = 2, 12

    key = jax.random.PRNGKey(0)
    x = jax.random.normal(key, (B, C, T), dtype=jnp.float32)

    module = DownSample1d(ratio=ratio, kernel_size=kernel_size)
    out = module(x)
    out = jax.block_until_ready(out)

    ref = _reference_downsample1d(
        np.asarray(x),
        np.asarray(module.downsample_filter),
        ratio,
        module.pad_left,
        module.pad_right,
    )
    assert out.shape == ref.shape, (out.shape, ref.shape)
    assert np.allclose(np.asarray(out), ref, atol=1e-4, rtol=1e-4), (
        np.max(np.abs(np.asarray(out) - ref))
    )

    print("KERNEL_OK")
</pallas_src>

<mosaic_0001>
module attributes {stable_mosaic.version = 11 : i64} {
  func.func @_banded_dwconv_kernel(%arg0: i32, %arg1: i32, %arg2: memref<8x1024xf32, #tpu.memory_space<vmem>>, %arg3: memref<8x128xf32, #tpu.memory_space<vmem>>, %arg4: memref<1024x512xf32, #tpu.memory_space<vmem>>, %arg5: memref<128x512xf32, #tpu.memory_space<vmem>>, %arg6: memref<8x512xf32, #tpu.memory_space<vmem>>) attributes {dimension_semantics = [#tpu.dimension_semantics<parallel>, #tpu.dimension_semantics<parallel>], iteration_bounds = array<i64: 1, 1>, scalar_prefetch = 0 : i64, scratch_operands = 0 : i64, tpu.core_type = #tpu.core_type<tc>, window_params = [{transform_indices = @transform_0, window_bounds = array<i64: 8, 1024>}, {transform_indices = @transform_1, window_bounds = array<i64: 8, 128>}, {pipeline_mode = #tpu.pipeline_mode<synchronous>, transform_indices = @transform_2, window_bounds = array<i64: 1024, 512>}, {pipeline_mode = #tpu.pipeline_mode<synchronous>, transform_indices = @transform_3, window_bounds = array<i64: 128, 512>}, {transform_indices = @transform_4, window_bounds = array<i64: 8, 512>}]} {
    %c0 = arith.constant 0 : index
    %c0_0 = arith.constant 0 : index
    %0 = vector.load %arg2[%c0, %c0_0] : memref<8x1024xf32, #tpu.memory_space<vmem>>, vector<8x1024xf32>
    %c0_1 = arith.constant 0 : index
    %c0_2 = arith.constant 0 : index
    %1 = vector.load %arg4[%c0_1, %c0_2] : memref<1024x512xf32, #tpu.memory_space<vmem>>, vector<1024x512xf32>
    %cst = arith.constant dense<0.000000e+00> : vector<8x512xf32>
    %2 = tpu.matmul %0, %1, %cst {dimension_numbers = #tpu.dot_dimension_numbers<[1], [0], [0], [1], [0, 0, 1, 1], [], []>} : vector<8x1024xf32>, vector<1024x512xf32>, vector<8x512xf32> -> vector<8x512xf32>
    %c0_3 = arith.constant 0 : index
    %c0_4 = arith.constant 0 : index
    %3 = vector.load %arg3[%c0_3, %c0_4] : memref<8x128xf32, #tpu.memory_space<vmem>>, vector<8x128xf32>
    %c0_5 = arith.constant 0 : index
    %c0_6 = arith.constant 0 : index
    %4 = vector.load %arg5[%c0_5, %c0_6] : memref<128x512xf32, #tpu.memory_space<vmem>>, vector<128x512xf32>
    %cst_7 = arith.constant dense<0.000000e+00> : vector<8x512xf32>
    %5 = tpu.matmul %3, %4, %cst_7 {dimension_numbers = #tpu.dot_dimension_numbers<[1], [0], [0], [1], [0, 0, 1, 1], [], []>} : vector<8x128xf32>, vector<128x512xf32>, vector<8x512xf32> -> vector<8x512xf32>
    %6 = arith.addf %2, %5 : vector<8x512xf32>
    %c0_8 = arith.constant 0 : index
    %c0_9 = arith.constant 0 : index
    %7 = vector.load %arg6[%c0_8, %c0_9] : memref<8x512xf32, #tpu.memory_space<vmem>>, vector<8x512xf32>
    tpu.vector_store %arg6[%c0_8, %c0_9], %6 {strides = array<i32>} : memref<8x512xf32, #tpu.memory_space<vmem>>, vector<8x512xf32>,
    return
  }
  func.func @transform_0(%arg0: i32, %arg1: i32) -> (i32, i32) {
    %c0_i32 = arith.constant 0 : i32
    return %arg0, %arg1 : i32, i32
  }
  func.func @transform_1(%arg0: i32, %arg1: i32) -> (i32, i32) {
    %c1_i32 = arith.constant 1 : i32
    %0 = arith.addi %arg1, %c1_i32 : i32
    %c8_i32 = arith.constant 8 : i32
    %1 = arith.muli %0, %c8_i32 : i32
    %c0_i32 = arith.constant 0 : i32
    return %arg0, %1 : i32, i32
  }
  func.func @transform_2(%arg0: i32, %arg1: i32) -> (i32, i32) {
    %c0_i32 = arith.constant 0 : i32
    %c0_i32_0 = arith.constant 0 : i32
    %c0_i32_1 = arith.constant 0 : i32
    return %c0_i32, %c0_i32_0 : i32, i32
  }
  func.func @transform_3(%arg0: i32, %arg1: i32) -> (i32, i32) {
    %c0_i32 = arith.constant 0 : i32
    %c0_i32_0 = arith.constant 0 : i32
    %c0_i32_1 = arith.constant 0 : i32
    return %c0_i32, %c0_i32_0 : i32, i32
  }
  func.func @transform_4(%arg0: i32, %arg1: i32) -> (i32, i32) {
    %c0_i32 = arith.constant 0 : i32
    return %arg0, %arg1 : i32, i32
  }
}

</mosaic_0001>

<bundles_post_ra>
// kernel: tpu_custom_call.1
= control target key start
LH: loop header
LB: loop body
LE: loop exit
PB: predicated region body
PF: predicated region fallthrough
CT: control target
= control target key end

     0   :  { %9 = vsyncpa [#allocation3], 0  ;;  %s2209_s0 = inlined_call_operand.hbm [shape: f32[8,2048], index: 0, kind: input, shape index: {}]   ;;  %s2210_s1 = inlined_call_operand.hbm [shape: f32[8,2048], index: 1, kind: input, shape index: {}]   ;;  %s2211_s2 = inlined_call_operand.hbm [shape: f32[1024,512], index: 2, kind: input, shape index: {}]   ;;  %s2212_s3 = inlined_call_operand.hbm [shape: f32[128,512], index: 3, kind: input, shape index: {}]   ;;  %s2213_s4 = inlined_call_operand.hbm [shape: f32[8,512], index: 4, kind: output, shape index: {}]  }
   0x1   :  { %10 = vsyncpa [#allocation6], 0 }
   0x2   :  { %11 = vsyncpa [#allocation9], 0  ;;  %s1391_s17 = scalar_lea.hbm %s2210_s1, 1024 }
   0x3   :  { %12 = vsyncpa [#allocation4], 0  ;;  %s2113_s18 = smov [#allocation5]   ;;  %s2114_s20 = smov [#allocation2]  }
   0x4   :  { %s33_s19 = sshll.u32 %s2113_s18, 4  ;;  %s19_s21 = sshll.u32 %s2114_s20, 4  ;;  %s34_s19 = int_to_ptr.vmem [resolvable:$true] %s33_s19  ;;  %s20_s21 = int_to_ptr.vmem [resolvable:$true] %s19_s21 }
   0x5   :  { %s2016_s24 = scalar_lea.hbm %s2210_s1, 1152  ;;  %s1994_s27 = scalar_lea.hbm %s2210_s1, 2048 }
   0x6   :  { %p1993_p0 = scmp.ne.s32.totalorder %s1391_s17, %s2016_s24  ;;  %p1995_p1 = scmp.lt.u32.totalorder %s1391_s17, %s2210_s1 }
   0x7   :  { %p1996_p2 = scmp.lt.u32.totalorder %s1994_s27, %s2016_s24  ;;  %p1998_p4 = scmp.lt.u32.totalorder %s2016_s24, %s1391_s17 }
   0x9   :  { %p1997_p3 = por %p1996_p2, %p1995_p1 }
   0xb   :  { %p1999_p5 = por %p1998_p4, %p1997_p3 }
   0xd   :  { %p2000_p6 = pnand %p1999_p5, %p1993_p0 }
   0xf   :  { %2003 = shalt.err (!%p2000_p6)
}
  0x10   :  { %s2004_s30 = scalar_lea.vmem %s34_s19, 128  ;;  %p2009_p8 = scmp.lt.s32.totalorder %s34_s19, %s34_s19 }
  0x11   :  { %p2005_p7 = scmp.ne.s32.totalorder %s34_s19, %s2004_s30  ;;  %p2010_p9 = scmp.lt.s32.totalorder %s2004_s30, %s2004_s30 }
  0x13   :  { %p2011_p10 = por %p2010_p9, %p2009_p8 }
  0x15   :  { %p2012_p11 = pnand %p2011_p10, %p2005_p7 }
  0x17   :  { %2015 = shalt.err (!%p2012_p11)
}
  0x18   :  { %36 = dma.hbm_to_vmem [thread:$0]  %s1391_s17, 128, %s34_s19, [#allocation6]  }
  0x19   :  { %s2017_s7 = scalar_lea.hbm %s2209_s0, 1024  ;;  %s2019_s11 = scalar_lea.hbm %s2209_s0, 2048 }
  0x1a   :  { %p2018_p12 = scmp.ne.s32.totalorder %s2209_s0, %s2017_s7  ;;  %p2020_p13 = scmp.lt.u32.totalorder %s2019_s11, %s2017_s7 }
  0x1b   :  { %p2021_p0 = scmp.lt.u32.totalorder %s2017_s7, %s2209_s0 }
  0x1d   :  { %p2022_p1 = por %p2021_p0, %p2020_p13 }
  0x1f   :  { %p2023_p2 = pnand %p2022_p1, %p2018_p12 }
  0x21   :  { %2026 = shalt.err (!%p2023_p2)
}
  0x22   :  { %s2027_s14 = scalar_lea.vmem %s20_s21, 1024  ;;  %p2032_p4 = scmp.lt.s32.totalorder %s20_s21, %s20_s21 }
  0x23   :  { %p2028_p3 = scmp.ne.s32.totalorder %s20_s21, %s2027_s14  ;;  %p2033_p5 = scmp.lt.s32.totalorder %s2027_s14, %s2027_s14 }
  0x25   :  { %p2034_p6 = por %p2033_p5, %p2032_p4 }
  0x27   :  { %p2035_p7 = pnand %p2034_p6, %p2028_p3 }
  0x29   :  { %2038 = shalt.err (!%p2035_p7)
}
  0x2a   :  { %22 = dma.hbm_to_vmem [thread:$0]  %s2209_s0, 1024, %s20_s21, [#allocation3]  }
  0x2b   :  { %s2115_s17 = smov [#allocation7]   ;;  %s2039_s22 = scalar_lea.hbm %s2211_s2, 65536 }
  0x2c   :  { %s42_s18 = sshll.u32 %s2115_s17, 4  ;;  %p2040_p8 = scmp.ne.s32.totalorder %s2211_s2, %s2039_s22  ;;  %s43_s18 = int_to_ptr.vmem [resolvable:$true] %s42_s18 }
  0x2d   :  { %p2043_p9 = scmp.lt.u32.totalorder %s2039_s22, %s2211_s2 }
  0x2f   :  { %p2045_p10 = pnand %p2043_p9, %p2040_p8 }
  0x31   :  { %2048 = shalt.err (!%p2045_p10)
}
  0x32   :  { %s2049_s27 = scalar_lea.vmem %s43_s18, 65536  ;;  %p2054_p12 = scmp.lt.s32.totalorder %s43_s18, %s43_s18 }
  0x33   :  { %p2050_p11 = scmp.ne.s32.totalorder %s43_s18, %s2049_s27  ;;  %p2055_p13 = scmp.lt.s32.totalorder %s2049_s27, %s2049_s27 }
  0x35   :  { %p2056_p0 = por %p2055_p13, %p2054_p12 }
  0x37   :  { %p2057_p1 = pnand %p2056_p0, %p2050_p11 }
  0x39   :  { %2060 = shalt.err (!%p2057_p1)
}
  0x3a   :  { %s2116_s0 = smov 512   ;;  %s2117_s21 = smov 32  }
  0x3b   :  { %48 = dma.hbm_to_vmem [thread:$0]  %s2211_s2, 65536, %s43_s18, [#allocation6], %s2116_s0, %s2116_s0, %s2117_s21  }
  0x3c   :  { %s2118_s30 = smov [#allocation8]   ;;  %s2061_s1 = scalar_lea.hbm %s2212_s3, 8192 }
  0x3d   :  { %s54_s5 = sshll.u32 %s2118_s30, 4  ;;  %p2062_p2 = scmp.ne.s32.totalorder %s2212_s3, %s2061_s1  ;;  %s55_s5 = int_to_ptr.vmem [resolvable:$true] %s54_s5 }
  0x3e   :  { %p2065_p3 = scmp.lt.u32.totalorder %s2061_s1, %s2212_s3 }
  0x40   :  { %p2067_p4 = pnand %p2065_p3, %p2062_p2 }
  0x42   :  { %2070 = shalt.err (!%p2067_p4)
}
  0x43   :  { %s2071_s12 = scalar_lea.vmem %s55_s5, 8192  ;;  %p2076_p6 = scmp.lt.s32.totalorder %s55_s5, %s55_s5 }
  0x44   :  { %p2072_p5 = scmp.ne.s32.totalorder %s55_s5, %s2071_s12  ;;  %p2077_p7 = scmp.lt.s32.totalorder %s2071_s12, %s2071_s12 }
  0x46   :  { %p2078_p8 = por %p2077_p7, %p2076_p6 }
  0x48   :  { %p2079_p9 = pnand %p2078_p8, %p2072_p5 }
  0x4a   :  { %2082 = shalt.err (!%p2079_p9)
}
  0x4b   :  { %60 = dma.hbm_to_vmem [thread:$0]  %s2212_s3, 8192, %s55_s5, [#allocation9], %s2116_s0, %s2116_s0, %s2117_s21  }
  0x4c   :  { %2105 = dma.done.wait [#allocation3], 1024  }
  0x4d   :  { %2106 = vsyncadd [#allocation3], 4294966272 }
  0x4e   :  { %2107 = dma.done.wait [#allocation6], 65664  }
  0x4f   :  { %2108 = vsyncadd [#allocation6], 4294901632 }
  0x50   :  { %2109 = dma.done.wait [#allocation9], 8192  }
  0x51   :  { %2110 = vsyncadd [#allocation9], 4294959104  ;;  %v2119_v0 = vmov 0.0   ;;  %v597_v1 = vld [vmem:[#allocation8 + $0x8] sm:$0xff]  ;;  %v599_v3 = vld [vmem:[#allocation8 + $0x18] sm:$0xff]  ;;  %s2120_s3 = smov [#allocation10]  }
  0x52   :  { %724 = vmatprep.mubr.f32.mxu0 %v2119_v0  ;;  %795 = vmatprep.mubr.f32.mxu1 %v2119_v0  ;;  %v601_v2 = vld [vmem:[#allocation8 + $0x28] sm:$0xff]  ;;  %v603_v5 = vld [vmem:[#allocation8 + $0x38] sm:$0xff]  ;;  %v596_v6 = vld [vmem:[#allocation8] sm:$0xff]  ;;  %s1380_s14 = sshll.u32 %s2120_s3, 4  ;;  %s1381_s14 = int_to_ptr.vmem [resolvable:$true] %s1380_s14 }
  0x53   :  { %v1392_v4 = vpack.c.bf16 %v601_v2, %v597_v1  ;;  %v600_v7 = vld [vmem:[#allocation8 + $0x20] sm:$0xff]  ;;  %v1424_v8 = vpack.c.bf16 %v603_v5, %v599_v3  ;;  %v598_v10 = vld [vmem:[#allocation8 + $0x10] sm:$0xff]  ;;  %v605_v12 = vld [vmem:[#allocation8 + $0x48] sm:$0xff]  ;;  %s2083_s15 = scalar_lea.vmem %s1381_s14, 512  ;;  %p2088_p11 = scmp.lt.s32.totalorder %s1381_s14, %s1381_s14 }
  0x54   :  { %v1394_v9 = vpack.c.bf16 %v600_v7, %v596_v6  ;;  %v602_v11 = vld [vmem:[#allocation8 + $0x30] sm:$0xff]  ;;  %v609_v14 = vld [vmem:[#allocation8 + $0x68] sm:$0xff]  ;;  %v607_v15 = vld [vmem:[#allocation8 + $0x58] sm:$0xff]  ;;  %p2084_p10 = scmp.ne.s32.totalorder %s1381_s14, %s2083_s15  ;;  %p2089_p12 = scmp.lt.s32.totalorder %s2083_s15, %s2083_s15 }
  0x55   :  { %1393 = vmatprep.subr.bf16.mxu0 %v1392_v4  ;;  %v1426_v13 = vpack.c.bf16 %v602_v11, %v598_v10  ;;  %v611_v16 = vld [vmem:[#allocation8 + $0x78] sm:$0xff]  ;;  %1425 = vmatprep.subr.bf16.mxu1 %v1424_v8  ;;  %v1396_v17 = vpack.c.bf16 %v609_v14, %v605_v12  ;;  %v604_v19 = vld [vmem:[#allocation8 + $0x40] sm:$0xff]  ;;  %v606_v21 = vld [vmem:[#allocation8 + $0x50] sm:$0xff] }
  0x56   :  { %1395 = vmatpush1.bf16.msra.mxu0 %v1394_v9  ;;  %v1428_v18 = vpack.c.bf16 %v611_v16, %v607_v15  ;;  %v608_v20 = vld [vmem:[#allocation8 + $0x60] sm:$0xff]  ;;  %v610_v23 = vld [vmem:[#allocation8 + $0x70] sm:$0xff]  ;;  %v613_v24 = vld [vmem:[#allocation8 + $0x88] sm:$0xff]  ;;  %p2090_p13 = por %p2089_p12, %p2088_p11 }
  0x57   :  { %1427 = vmatpush1.bf16.msra.mxu1 %v1426_v13  ;;  %v1398_v22 = vpack.c.bf16 %v608_v20, %v604_v19  ;;  %v617_v25 = vld [vmem:[#allocation8 + $0xa8] sm:$0xff]  ;;  %1397 = vmatprep.subr.bf16.mxu0 %v1396_v17  ;;  %v1430_v26 = vpack.c.bf16 %v610_v23, %v606_v21  ;;  %v615_v28 = vld [vmem:[#allocation8 + $0x98] sm:$0xff]  ;;  %v612_v30 = vld [vmem:[#allocation8 + $0x80] sm:$0xff] }
  0x58   :  { %1429 = vmatprep.subr.bf16.mxu1 %v1428_v18  ;;  %v1400_v27 = vpack.c.bf16 %v617_v25, %v613_v24  ;;  %v619_v29 = vld [vmem:[#allocation8 + $0xb8] sm:$0xff]  ;;  %v616_v32 = vld [vmem:[#allocation8 + $0xa0] sm:$0xff]  ;;  %v614_v33 = vld [vmem:[#allocation8 + $0x90] sm:$0xff]  ;;  %p2091_p0 = pnand %p2090_p13, %p2084_p10 }
  0x59   :  { %v1432_v31 = vpack.c.bf16 %v619_v29, %v615_v28  ;;  %v618_v34 = vld [vmem:[#allocation8 + $0xb0] sm:$0xff]  ;;  %v1402_v35 = vpack.c.bf16 %v616_v32, %v612_v30  ;;  %v621_v36 = vld [vmem:[#allocation8 + $0xc8] sm:$0xff]  ;;  %v623_v38 = vld [vmem:[#allocation8 + $0xd8] sm:$0xff] }
  0x5a   :  { %1399 = vmatpush1.bf16.msra.mxu0 %v1398_v22  ;;  %v625_v37 = vld [vmem:[#allocation8 + $0xe8] sm:$0xff]  ;;  %v1434_v39 = vpack.c.bf16 %v618_v34, %v614_v33  ;;  %v627_v41 = vld [vmem:[#allocation8 + $0xf8] sm:$0xff]  ;;  %v620_v42 = vld [vmem:[#allocation8 + $0xc0] sm:$0xff] }
  0x5b   :  { %1431 = vmatpush1.bf16.msra.mxu1 %v1430_v26  ;;  %1401 = vmatprep.subr.bf16.mxu0 %v1400_v27  ;;  %v1404_v40 = vpack.c.bf16 %v625_v37, %v621_v36  ;;  %v624_v43 = vld [vmem:[#allocation8 + $0xe0] sm:$0xff]  ;;  %v1436_v44 = vpack.c.bf16 %v627_v41, %v623_v38  ;;  %v622_v45 = vld [vmem:[#allocation8 + $0xd0] sm:$0xff]  ;;  %v629_v47 = vld [vmem:[#allocation8 + $0x108] sm:$0xff] }
  0x5c   :  { %1433 = vmatprep.subr.bf16.mxu1 %v1432_v31  ;;  %v626_v46 = vld [vmem:[#allocation8 + $0xf0] sm:$0xff]  ;;  %v633_v48 = vld [vmem:[#allocation8 + $0x128] sm:$0xff]  ;;  %v631_v49 = vld [vmem:[#allocation8 + $0x118] sm:$0xff]  ;;  %v1406_v51 = vpack.c.bf16 %v624_v43, %v620_v42 }
  0x5d   :  { %v635_v50 = vld [vmem:[#allocation8 + $0x138] sm:$0xff]  ;;  %v1438_v52 = vpack.c.bf16 %v626_v46, %v622_v45  ;;  %v1408_v53 = vpack.c.bf16 %v633_v48, %v629_v47  ;;  %v628_v54 = vld [vmem:[#allocation8 + $0x100] sm:$0xff]  ;;  %v630_v56 = vld [vmem:[#allocation8 + $0x110] sm:$0xff] }
  0x5e   :  { %1403 = vmatpush1.bf16.msra.mxu0 %v1402_v35  ;;  %v632_v55 = vld [vmem:[#allocation8 + $0x120] sm:$0xff]  ;;  %v1440_v57 = vpack.c.bf16 %v635_v50, %v631_v49  ;;  %v634_v58 = vld [vmem:[#allocation8 + $0x130] sm:$0xff]  ;;  %v637_v59 = vld [vmem:[#allocation8 + $0x148] sm:$0xff] }
  0x5f   :  { %1435 = vmatpush1.bf16.msra.mxu1 %v1434_v39  ;;  %1405 = vmatprep.subr.bf16.mxu0 %v1404_v40  ;;  %v641_v60 = vld [vmem:[#allocation8 + $0x168] sm:$0xff]  ;;  %v639_v61 = vld [vmem:[#allocation8 + $0x158] sm:$0xff]  ;;  %v1410_v63 = vpack.c.bf16 %v632_v55, %v628_v54  ;;  %v1442_v0 = vpack.c.bf16 %v634_v58, %v630_v56  ;;  %v636_v2 = vld [vmem:[#allocation8 + $0x140] sm:$0xff] }
  0x60   :  { %1437 = vmatprep.subr.bf16.mxu1 %v1436_v44  ;;  %v643_v62 = vld [vmem:[#allocation8 + $0x178] sm:$0xff]  ;;  %v1412_v1 = vpack.c.bf16 %v641_v60, %v637_v59  ;;  %v640_v3 = vld [vmem:[#allocation8 + $0x160] sm:$0xff]  ;;  %v638_v4 = vld [vmem:[#allocation8 + $0x150] sm:$0xff] }
  0x61   :  { %v1444_v5 = vpack.c.bf16 %v643_v62, %v639_v61  ;;  %v642_v6 = vld [vmem:[#allocation8 + $0x170] sm:$0xff]  ;;  %v645_v7 = vld [vmem:[#allocation8 + $0x188] sm:$0xff]  ;;  %v647_v9 = vld [vmem:[#allocation8 + $0x198] sm:$0xff]  ;;  %v1414_v11 = vpack.c.bf16 %v640_v3, %v636_v2 }
  0x62   :  { %1407 = vmatpush1.bf16.msra.mxu0 %v1406_v51  ;;  %v649_v8 = vld [vmem:[#allocation8 + $0x1a8] sm:$0xff]  ;;  %v651_v10 = vld [vmem:[#allocation8 + $0x1b8] sm:$0xff]  ;;  %v1446_v12 = vpack.c.bf16 %v642_v6, %v638_v4  ;;  %v644_v14 = vld [vmem:[#allocation8 + $0x180] sm:$0xff] }
  0x63   :  { %1439 = vmatpush1.bf16.msra.mxu1 %v1438_v52  ;;  %1409 = vmatprep.subr.bf16.mxu0 %v1408_v53  ;;  %v1416_v13 = vpack.c.bf16 %v649_v8, %v645_v7  ;;  %v648_v15 = vld [vmem:[#allocation8 + $0x1a0] sm:$0xff]  ;;  %v646_v16 = vld [vmem:[#allocation8 + $0x190] sm:$0xff]  ;;  %v1448_v17 = vpack.c.bf16 %v651_v10, %v647_v9  ;;  %v653_v19 = vld [vmem:[#allocation8 + $0x1c8] sm:$0xff] }
  0x64   :  { %1441 = vmatprep.subr.bf16.mxu1 %v1440_v57  ;;  %v650_v18 = vld [vmem:[#allocation8 + $0x1b0] sm:$0xff]  ;;  %v657_v20 = vld [vmem:[#allocation8 + $0x1e8] sm:$0xff]  ;;  %v655_v21 = vld [vmem:[#allocation8 + $0x1d8] sm:$0xff]  ;;  %v1418_v23 = vpack.c.bf16 %v648_v15, %v644_v14 }
  0x65   :  { %v659_v22 = vld [vmem:[#allocation8 + $0x1f8] sm:$0xff]  ;;  %v1450_v24 = vpack.c.bf16 %v650_v18, %v646_v16  ;;  %v1420_v25 = vpack.c.bf16 %v657_v20, %v653_v19  ;;  %v652_v26 = vld [vmem:[#allocation8 + $0x1c0] sm:$0xff]  ;;  %v654_v28 = vld [vmem:[#allocation8 + $0x1d0] sm:$0xff] }
  0x66   :  { %1411 = vmatpush1.bf16.msra.mxu0 %v1410_v63  ;;  %v656_v27 = vld [vmem:[#allocation8 + $0x1e0] sm:$0xff]  ;;  %v1452_v29 = vpack.c.bf16 %v659_v22, %v655_v21  ;;  %v658_v30 = vld [vmem:[#allocation8 + $0x1f0] sm:$0xff]  ;;  %v84_v31 = vld [vmem:[#allocation7 + $0x8] sm:$0xff] }
  0x67   :  { %1443 = vmatpush1.bf16.msra.mxu1 %v1442_v0  ;;  %1413 = vmatprep.subr.bf16.mxu0 %v1412_v1  ;;  %v88_v32 = vld [vmem:[#allocation7 + $0x28] sm:$0xff]  ;;  %v86_v33 = vld [vmem:[#allocation7 + $0x18] sm:$0xff]  ;;  %v1422_v35 = vpack.c.bf16 %v656_v27, %v652_v26  ;;  %v1454_v36 = vpack.c.bf16 %v658_v30, %v654_v28  ;;  %v83_v38 = vld [vmem:[#allocation7] sm:$0xff] }
  0x68   :  { %1445 = vmatprep.subr.bf16.mxu1 %v1444_v5  ;;  %v90_v34 = vld [vmem:[#allocation7 + $0x38] sm:$0xff]  ;;  %v1456_v37 = vpack.c.bf16 %v88_v32, %v84_v31  ;;  %v87_v39 = vld [vmem:[#allocation7 + $0x20] sm:$0xff]  ;;  %v85_v40 = vld [vmem:[#allocation7 + $0x10] sm:$0xff] }
  0x69   :  { %v1712_v41 = vpack.c.bf16 %v90_v34, %v86_v33  ;;  %v89_v42 = vld [vmem:[#allocation7 + $0x30] sm:$0xff]  ;;  %v92_v43 = vld [vmem:[#allocation7 + $0x48] sm:$0xff]  ;;  %v94_v45 = vld [vmem:[#allocation7 + $0x58] sm:$0xff]  ;;  %v1458_v48 = vpack.c.bf16 %v87_v39, %v83_v38 }
  0x6a   :  { %1415 = vmatpush1.bf16.msra.mxu0 %v1414_v11  ;;  %v96_v44 = vld [vmem:[#allocation7 + $0x68] sm:$0xff]  ;;  %v98_v46 = vld [vmem:[#allocation7 + $0x78] sm:$0xff]  ;;  %v1714_v49 = vpack.c.bf16 %v89_v42, %v85_v40  ;;  %v91_v51 = vld [vmem:[#allocation7 + $0x40] sm:$0xff] }
  0x6b   :  { %1447 = vmatpush1.bf16.msra.mxu1 %v1446_v12  ;;  %1417 = vmatprep.subr.bf16.mxu0 %v1416_v13  ;;  %v595_v47 = vld [vmem:[#allocation5] sm:$0xff]  ;;  %v1460_v50 = vpack.c.bf16 %v96_v44, %v92_v43  ;;  %v95_v52 = vld [vmem:[#allocation7 + $0x60] sm:$0xff]  ;;  %v93_v53 = vld [vmem:[#allocation7 + $0x50] sm:$0xff]  ;;  %v1716_v54 = vpack.c.bf16 %v98_v46, %v94_v45 }
  0x6c   :  { %1449 = vmatprep.subr.bf16.mxu1 %v1448_v17  ;;  %v97_v55 = vld [vmem:[#allocation7 + $0x70] sm:$0xff]  ;;  %v100_v56 = vld [vmem:[#allocation7 + $0x88] sm:$0xff]  ;;  %v102_v58 = vld [vmem:[#allocation7 + $0x98] sm:$0xff]  ;;  %v1462_v60 = vpack.c.bf16 %v95_v52, %v91_v51 }
  0x6d   :  { %v104_v57 = vld [vmem:[#allocation7 + $0xa8] sm:$0xff]  ;;  %v106_v59 = vld [vmem:[#allocation7 + $0xb8] sm:$0xff]  ;;  %v1718_v61 = vpack.c.bf16 %v97_v55, %v93_v53  ;;  %v99_v63 = vld [vmem:[#allocation7 + $0x80] sm:$0xff] }
  0x6e   :  { %1419 = vmatpush1.bf16.msra.mxu0 %v1418_v23  ;;  %v1464_v62 = vpack.c.bf16 %v104_v57, %v100_v56  ;;  %v103_v0 = vld [vmem:[#allocation7 + $0xa0] sm:$0xff]  ;;  %v101_v1 = vld [vmem:[#allocation7 + $0x90] sm:$0xff]  ;;  %v1720_v2 = vpack.c.bf16 %v106_v59, %v102_v58  ;;  %v108_v4 = vld [vmem:[#allocation7 + $0xc8] sm:$0xff] }
  0x6f   :  { %1451 = vmatpush1.bf16.msra.mxu1 %v1450_v24  ;;  %1421 = vmatprep.subr.bf16.mxu0 %v1420_v25  ;;  %v105_v3 = vld [vmem:[#allocation7 + $0xb0] sm:$0xff]  ;;  %v112_v5 = vld [vmem:[#allocation7 + $0xe8] sm:$0xff]  ;;  %v110_v6 = vld [vmem:[#allocation7 + $0xd8] sm:$0xff]  ;;  %v1466_v8 = vpack.c.bf16 %v103_v0, %v99_v63 }
  0x70   :  { %1453 = vmatprep.subr.bf16.mxu1 %v1452_v29  ;;  %v114_v7 = vld [vmem:[#allocation7 + $0xf8] sm:$0xff]  ;;  %v1722_v9 = vpack.c.bf16 %v105_v3, %v101_v1  ;;  %v1468_v10 = vpack.c.bf16 %v112_v5, %v108_v4  ;;  %v107_v11 = vld [vmem:[#allocation7 + $0xc0] sm:$0xff]  ;;  %v109_v13 = vld [vmem:[#allocation7 + $0xd0] sm:$0xff] }
  0x71   :  { %v111_v12 = vld [vmem:[#allocation7 + $0xe0] sm:$0xff]  ;;  %v1724_v14 = vpack.c.bf16 %v114_v7, %v110_v6  ;;  %v113_v15 = vld [vmem:[#allocation7 + $0xf0] sm:$0xff]  ;;  %v116_v16 = vld [vmem:[#allocation7 + $0x108] sm:$0xff] }
  0x72   :  { %1423 = vmatpush1.bf16.msra.mxu0 %v1422_v35  ;;  %v120_v17 = vld [vmem:[#allocation7 + $0x128] sm:$0xff]  ;;  %v118_v18 = vld [vmem:[#allocation7 + $0x118] sm:$0xff]  ;;  %v1470_v20 = vpack.c.bf16 %v111_v12, %v107_v11  ;;  %v1726_v21 = vpack.c.bf16 %v113_v15, %v109_v13  ;;  %v115_v23 = vld [vmem:[#allocation7 + $0x100] sm:$0xff] }
  0x73   :  { %1455 = vmatpush1.bf16.msra.mxu1 %v1454_v36  ;;  %1457 = vmatprep.subr.bf16.mxu0 %v1456_v37  ;;  %v122_v19 = vld [vmem:[#allocation7 + $0x138] sm:$0xff]  ;;  %v1472_v22 = vpack.c.bf16 %v120_v17, %v116_v16  ;;  %v119_v24 = vld [vmem:[#allocation7 + $0x120] sm:$0xff]  ;;  %v117_v25 = vld [vmem:[#allocation7 + $0x110] sm:$0xff] }
  0x74   :  { %1713 = vmatprep.subr.bf16.mxu1 %v1712_v41  ;;  %v1728_v26 = vpack.c.bf16 %v122_v19, %v118_v18  ;;  %v121_v27 = vld [vmem:[#allocation7 + $0x130] sm:$0xff]  ;;  %v124_v28 = vld [vmem:[#allocation7 + $0x148] sm:$0xff]  ;;  %v126_v30 = vld [vmem:[#allocation7 + $0x158] sm:$0xff]  ;;  %v1474_v32 = vpack.c.bf16 %v119_v24, %v115_v23 }
  0x75   :  { %725 = vmatmul.mubr.f32.vlgmr.msra.gmra.mrb[0].mxu0 %v595_v47  ;;  %v128_v29 = vld [vmem:[#allocation7 + $0x168] sm:$0xff]  ;;  %v130_v31 = vld [vmem:[#allocation7 + $0x178] sm:$0xff]  ;;  %v1730_v33 = vpack.c.bf16 %v121_v27, %v117_v25  ;;  %v123_v35 = vld [vmem:[#allocation7 + $0x140] sm:$0xff] }
  0x76   :  { %796 = vmatmul.mubr.f32.vlgmr.msra.gmra.mrb[0].mxu1 %v595_v47  ;;  %1459 = vmatpush1.bf16.msra.mxu0 %v1458_v48  ;;  %v1476_v34 = vpack.c.bf16 %v128_v29, %v124_v28  ;;  %v127_v36 = vld [vmem:[#allocation7 + $0x160] sm:$0xff]  ;;  %v125_v37 = vld [vmem:[#allocation7 + $0x150] sm:$0xff]  ;;  %v1732_v38 = vpack.c.bf16 %v130_v31, %v126_v30  ;;  %v132_v40 = vld [vmem:[#allocation7 + $0x188] sm:$0xff] }
  0x77   :  { %1715 = vmatpush1.bf16.msra.mxu1 %v1714_v49  ;;  %1461 = vmatprep.subr.bf16.mxu0 %v1460_v50  ;;  %v129_v39 = vld [vmem:[#allocation7 + $0x170] sm:$0xff]  ;;  %v136_v41 = vld [vmem:[#allocation7 + $0x1a8] sm:$0xff]  ;;  %v134_v42 = vld [vmem:[#allocation7 + $0x198] sm:$0xff]  ;;  %v1478_v44 = vpack.c.bf16 %v127_v36, %v123_v35 }
  0x78   :  { %1717 = vmatprep.subr.bf16.mxu1 %v1716_v54  ;;  %v138_v43 = vld [vmem:[#allocation7 + $0x1b8] sm:$0xff]  ;;  %v1734_v45 = vpack.c.bf16 %v129_v39, %v125_v37  ;;  %v1480_v46 = vpack.c.bf16 %v136_v41, %v132_v40  ;;  %v131_v47 = vld [vmem:[#allocation7 + $0x180] sm:$0xff]  ;;  %v133_v49 = vld [vmem:[#allocation7 + $0x190] sm:$0xff] }
  0x79   :  { %v135_v48 = vld [vmem:[#allocation7 + $0x1a0] sm:$0xff]  ;;  %v1736_v50 = vpack.c.bf16 %v138_v43, %v134_v42  ;;  %v137_v51 = vld [vmem:[#allocation7 + $0x1b0] sm:$0xff]  ;;  %v140_v52 = vld [vmem:[#allocation7 + $0x1c8] sm:$0xff] }
  0x7a   :  { %1463 = vmatpush1.bf16.msra.mxu0 %v1462_v60  ;;  %v144_v53 = vld [vmem:[#allocation7 + $0x1e8] sm:$0xff]  ;;  %v142_v54 = vld [vmem:[#allocation7 + $0x1d8] sm:$0xff]  ;;  %v1482_v56 = vpack.c.bf16 %v135_v48, %v131_v47  ;;  %v1738_v57 = vpack.c.bf16 %v137_v51, %v133_v49  ;;  %v139_v59 = vld [vmem:[#allocation7 + $0x1c0] sm:$0xff] }
  0x7b   :  { %1719 = vmatpush1.bf16.msra.mxu1 %v1718_v61  ;;  %1465 = vmatprep.subr.bf16.mxu0 %v1464_v62  ;;  %v146_v55 = vld [vmem:[#allocation7 + $0x1f8] sm:$0xff]  ;;  %v1484_v58 = vpack.c.bf16 %v144_v53, %v140_v52  ;;  %v143_v60 = vld [vmem:[#allocation7 + $0x1e0] sm:$0xff]  ;;  %v141_v61 = vld [vmem:[#allocation7 + $0x1d0] sm:$0xff] }
  0x7c   :  { %1721 = vmatprep.subr.bf16.mxu1 %v1720_v2  ;;  %v1740_v62 = vpack.c.bf16 %v146_v55, %v142_v54  ;;  %v145_v63 = vld [vmem:[#allocation7 + $0x1f0] sm:$0xff]  ;;  %v148_v0 = vld [vmem:[#allocation7 + $0x208] sm:$0xff]  ;;  %v150_v2 = vld [vmem:[#allocation7 + $0x218] sm:$0xff]  ;;  %v1486_v4 = vpack.c.bf16 %v143_v60, %v139_v59 }
  0x7d   :  { %v152_v1 = vld [vmem:[#allocation7 + $0x228] sm:$0xff]  ;;  %v154_v3 = vld [vmem:[#allocation7 + $0x238] sm:$0xff]  ;;  %v1742_v5 = vpack.c.bf16 %v145_v63, %v141_v61  ;;  %v147_v7 = vld [vmem:[#allocation7 + $0x200] sm:$0xff] }
  0x7e   :  { %1467 = vmatpush1.bf16.msra.mxu0 %v1466_v8  ;;  %v1488_v6 = vpack.c.bf16 %v152_v1, %v148_v0  ;;  %v151_v8 = vld [vmem:[#allocation7 + $0x220] sm:$0xff]  ;;  %v153_v11 = vld [vmem:[#allocation7 + $0x230] sm:$0xff]  ;;  %v156_v12 = vld [vmem:[#allocation7 + $0x248] sm:$0xff] }
  0x7f   :  { %1723 = vmatpush1.bf16.msra.mxu1 %v1722_v9  ;;  %1469 = vmatprep.subr.bf16.mxu0 %v1468_v10  ;;  %v149_v9 = vld [vmem:[#allocation7 + $0x210] sm:$0xff]  ;;  %v1744_v10 = vpack.c.bf16 %v154_v3, %v150_v2  ;;  %v160_v13 = vld [vmem:[#allocation7 + $0x268] sm:$0xff]  ;;  %v162_v15 = vld [vmem:[#allocation7 + $0x278] sm:$0xff]  ;;  %v1490_v16 = vpack.c.bf16 %v151_v8, %v147_v7 }
  0x80   :  { %1725 = vmatprep.subr.bf16.mxu1 %v1724_v14  ;;  %v158_v14 = vld [vmem:[#allocation7 + $0x258] sm:$0xff]  ;;  %v76_v17 = vld [vmem:[#allocation2 + $0x8] sm:$0xff]  ;;  %v1746_v18 = vpack.c.bf16 %v153_v11, %v149_v9  ;;  %v1492_v19 = vpack.c.bf16 %v160_v13, %v156_v12  ;;  %v161_v24 = vld [vmem:[#allocation7 + $0x270] sm:$0xff] }
  0x81   :  { %v1748_v23 = vpack.c.bf16 %v162_v15, %v158_v14  ;;  %v164_v25 = vld [vmem:[#allocation7 + $0x288] sm:$0xff]  ;;  %866 = vmatprep.mubr.f32.mxu0 %v76_v17  ;;  %v166_v27 = vld [vmem:[#allocation7 + $0x298] sm:$0xff]  ;;  %1150 = vmatprep.mubr.f32.mxu1 %v76_v17  ;;  %v169_v36 = vld [vmem:[#allocation7 + $0x2b0] sm:$0xff] }
  0x82   :  { %1471 = vmatpush1.bf16.msra.mxu0 %v1470_v20  ;;  %v155_v20 = vld [vmem:[#allocation7 + $0x240] sm:$0xff]  ;;  %v170_v28 = vld [vmem:[#allocation7 + $0x2b8] sm:$0xff]  ;;  %v172_v37 = vld [vmem:[#allocation7 + $0x2c8] sm:$0xff] }
  0x83   :  { %1727 = vmatpush1.bf16.msra.mxu1 %v1726_v21  ;;  %1473 = vmatprep.subr.bf16.mxu0 %v1472_v22  ;;  %v159_v21 = vld [vmem:[#allocation7 + $0x260] sm:$0xff]  ;;  %v157_v22 = vld [vmem:[#allocation7 + $0x250] sm:$0xff]  ;;  %v1752_v35 = vpack.c.bf16 %v170_v28, %v166_v27  ;;  %v174_v39 = vld [vmem:[#allocation7 + $0x2d8] sm:$0xff] }
  0x84   :  { %1729 = vmatprep.subr.bf16.mxu1 %v1728_v26  ;;  %v168_v26 = vld [vmem:[#allocation7 + $0x2a8] sm:$0xff]  ;;  %v1494_v29 = vpack.c.bf16 %v159_v21, %v155_v20  ;;  %v1750_v30 = vpack.c.bf16 %v161_v24, %v157_v22  ;;  %v178_v40 = vld [vmem:[#allocation7 + $0x2f8] sm:$0xff]  ;;  %v177_v48 = vld [vmem:[#allocation7 + $0x2f0] sm:$0xff] }
  0x85   :  { %v1496_v31 = vpack.c.bf16 %v168_v26, %v164_v25  ;;  %v1756_v47 = vpack.c.bf16 %v178_v40, %v174_v39  ;;  %v180_v49 = vld [vmem:[#allocation7 + $0x308] sm:$0xff]  ;;  %v182_v51 = vld [vmem:[#allocation7 + $0x318] sm:$0xff]  ;;  %v185_v60 = vld [vmem:[#allocation7 + $0x330] sm:$0xff] }
  0x86   :  { %1475 = vmatpush1.bf16.msra.mxu0 %v1474_v32  ;;  %v163_v32 = vld [vmem:[#allocation7 + $0x280] sm:$0xff]  ;;  %v186_v52 = vld [vmem:[#allocation7 + $0x338] sm:$0xff]  ;;  %v188_v61 = vld [vmem:[#allocation7 + $0x348] sm:$0xff] }
  0x87   :  { %1731 = vmatpush1.bf16.msra.mxu1 %v1730_v33  ;;  %1477 = vmatprep.subr.bf16.mxu0 %v1476_v34  ;;  %v167_v33 = vld [vmem:[#allocation7 + $0x2a0] sm:$0xff]  ;;  %v165_v34 = vld [vmem:[#allocation7 + $0x290] sm:$0xff]  ;;  %v1760_v59 = vpack.c.bf16 %v186_v52, %v182_v51  ;;  %v190_v63 = vld [vmem:[#allocation7 + $0x358] sm:$0xff] }
  0x88   :  { %1733 = vmatprep.subr.bf16.mxu1 %v1732_v38  ;;  %v176_v38 = vld [vmem:[#allocation7 + $0x2e8] sm:$0xff]  ;;  %v1498_v41 = vpack.c.bf16 %v167_v33, %v163_v32  ;;  %v1754_v42 = vpack.c.bf16 %v169_v36, %v165_v34  ;;  %v194_v0 = vld [vmem:[#allocation7 + $0x378] sm:$0xff]  ;;  %v193_v8 = vld [vmem:[#allocation7 + $0x370] sm:$0xff] }
  0x89   :  { %v1500_v43 = vpack.c.bf16 %v176_v38, %v172_v37  ;;  %v1764_v7 = vpack.c.bf16 %v194_v0, %v190_v63  ;;  %v196_v9 = vld [vmem:[#allocation7 + $0x388] sm:$0xff]  ;;  %v198_v11 = vld [vmem:[#allocation7 + $0x398] sm:$0xff]  ;;  %v199_v17 = vld [vmem:[#allocation7 + $0x3a0] sm:$0xff] }
  0x8a   :  { %1479 = vmatpush1.bf16.msra.mxu0 %v1478_v44  ;;  %v171_v44 = vld [vmem:[#allocation7 + $0x2c0] sm:$0xff]  ;;  %v202_v12 = vld [vmem:[#allocation7 + $0x3b8] sm:$0xff]  ;;  %v201_v20 = vld [vmem:[#allocation7 + $0x3b0] sm:$0xff] }
  0x8b   :  { %1735 = vmatpush1.bf16.msra.mxu1 %v1734_v45  ;;  %1481 = vmatprep.subr.bf16.mxu0 %v1480_v46  ;;  %v175_v45 = vld [vmem:[#allocation7 + $0x2e0] sm:$0xff]  ;;  %v173_v46 = vld [vmem:[#allocation7 + $0x2d0] sm:$0xff]  ;;  %v204_v21 = vld [vmem:[#allocation7 + $0x3c8] sm:$0xff] }
  0x8c   :  { %1737 = vmatprep.subr.bf16.mxu1 %v1736_v50  ;;  %v184_v50 = vld [vmem:[#allocation7 + $0x328] sm:$0xff]  ;;  %v1502_v53 = vpack.c.bf16 %v175_v45, %v171_v44  ;;  %v1758_v54 = vpack.c.bf16 %v177_v48, %v173_v46  ;;  %v210_v24 = vld [vmem:[#allocation7 + $0x3f8] sm:$0xff]  ;;  %v203_v28 = vld [vmem:[#allocation7 + $0x3c0] sm:$0xff] }
  0x8d   :  { %v1504_v55 = vpack.c.bf16 %v184_v50, %v180_v49  ;;  %v208_v22 = vld [vmem:[#allocation7 + $0x3e8] sm:$0xff]  ;;  %v209_v32 = vld [vmem:[#allocation7 + $0x3f0] sm:$0xff]  ;;  %v218_v36 = vld [vmem:[#allocation7 + $0x438] sm:$0xff] }
  0x8e   :  { %1483 = vmatpush1.bf16.msra.mxu0 %v1482_v56  ;;  %v179_v56 = vld [vmem:[#allocation7 + $0x300] sm:$0xff]  ;;  %v1516_v27 = vpack.c.bf16 %v208_v22, %v204_v21  ;;  %v212_v33 = vld [vmem:[#allocation7 + $0x408] sm:$0xff]  ;;  %v217_v44 = vld [vmem:[#allocation7 + $0x430] sm:$0xff] }
  0x8f   :  { %1739 = vmatpush1.bf16.msra.mxu1 %v1738_v57  ;;  %1485 = vmatprep.subr.bf16.mxu0 %v1484_v58  ;;  %v183_v57 = vld [vmem:[#allocation7 + $0x320] sm:$0xff]  ;;  %v181_v58 = vld [vmem:[#allocation7 + $0x310] sm:$0xff]  ;;  %v216_v34 = vld [vmem:[#allocation7 + $0x428] sm:$0xff] }
  0x90   :  { %1741 = vmatprep.subr.bf16.mxu1 %v1740_v62  ;;  %v192_v62 = vld [vmem:[#allocation7 + $0x368] sm:$0xff]  ;;  %v1506_v1 = vpack.c.bf16 %v183_v57, %v179_v56  ;;  %v1762_v2 = vpack.c.bf16 %v185_v60, %v181_v58  ;;  %v1520_v39 = vpack.c.bf16 %v216_v34, %v212_v33  ;;  %v211_v40 = vld [vmem:[#allocation7 + $0x400] sm:$0xff]  ;;  %v226_v48 = vld [vmem:[#allocation7 + $0x478] sm:$0xff] }
  0x91   :  { %v1508_v3 = vpack.c.bf16 %v192_v62, %v188_v61  ;;  %v220_v45 = vld [vmem:[#allocation7 + $0x448] sm:$0xff]  ;;  %v75_v49 = vld [vmem:[#allocation2] sm:$0xff]  ;;  %v225_v57 = vld [vmem:[#allocation7 + $0x470] sm:$0xff] }
  0x92   :  { %1487 = vmatpush1.bf16.msra.mxu0 %v1486_v4  ;;  %v187_v4 = vld [vmem:[#allocation7 + $0x340] sm:$0xff]  ;;  %v224_v46 = vld [vmem:[#allocation7 + $0x468] sm:$0xff]  ;;  %v230_v60 = vld [vmem:[#allocation7 + $0x498] sm:$0xff] }
  0x93   :  { %1743 = vmatpush1.bf16.msra.mxu1 %v1742_v5  ;;  %1489 = vmatprep.subr.bf16.mxu0 %v1488_v6  ;;  %v191_v5 = vld [vmem:[#allocation7 + $0x360] sm:$0xff]  ;;  %v189_v6 = vld [vmem:[#allocation7 + $0x350] sm:$0xff]  ;;  %v1524_v52 = vpack.c.bf16 %v224_v46, %v220_v45  ;;  %v228_v58 = vld [vmem:[#allocation7 + $0x488] sm:$0xff] }
  0x94   :  { %1745 = vmatprep.subr.bf16.mxu1 %v1744_v10  ;;  %v200_v10 = vld [vmem:[#allocation7 + $0x3a8] sm:$0xff]  ;;  %v1510_v13 = vpack.c.bf16 %v191_v5, %v187_v4  ;;  %v1766_v14 = vpack.c.bf16 %v193_v8, %v189_v6  ;;  %v234_v61 = vld [vmem:[#allocation7 + $0x4b8] sm:$0xff]  ;;  %v233_v5 = vld [vmem:[#allocation7 + $0x4b0] sm:$0xff] }
  0x95   :  { %v1512_v15 = vpack.c.bf16 %v200_v10, %v196_v9  ;;  %v1784_v4 = vpack.c.bf16 %v234_v61, %v230_v60  ;;  %v236_v6 = vld [vmem:[#allocation7 + $0x4c8] sm:$0xff]  ;;  %v238_v8 = vld [vmem:[#allocation7 + $0x4d8] sm:$0xff]  ;;  %v78_v22 = vld [vmem:[#allocation2 + $0x18] sm:$0xff] }
  0x96   :  { %1491 = vmatpush1.bf16.msra.mxu0 %v1490_v16  ;;  %v195_v16 = vld [vmem:[#allocation7 + $0x380] sm:$0xff]  ;;  %v242_v9 = vld [vmem:[#allocation7 + $0x4f8] sm:$0xff] }
  0x97   :  { %1747 = vmatpush1.bf16.msra.mxu1 %v1746_v18  ;;  %1493 = vmatprep.subr.bf16.mxu0 %v1492_v19  ;;  %v197_v18 = vld [vmem:[#allocation7 + $0x390] sm:$0xff]  ;;  %v1768_v19 = vpack.c.bf16 %v202_v12, %v198_v11  ;;  %v1514_v25 = vpack.c.bf16 %v199_v17, %v195_v16  ;;  %v1788_v16 = vpack.c.bf16 %v242_v9, %v238_v8  ;;  %v250_v21 = vld [vmem:[#allocation7 + $0x538] sm:$0xff] }
  0x98   :  { %1749 = vmatprep.subr.bf16.mxu1 %v1748_v23  ;;  %v206_v23 = vld [vmem:[#allocation7 + $0x3d8] sm:$0xff]  ;;  %v1770_v26 = vpack.c.bf16 %v201_v20, %v197_v18  ;;  %v241_v17 = vld [vmem:[#allocation7 + $0x4f0] sm:$0xff]  ;;  %v244_v18 = vld [vmem:[#allocation7 + $0x508] sm:$0xff] }
  0x99   :  { %v246_v20 = vld [vmem:[#allocation7 + $0x518] sm:$0xff] }
  0x9a   :  { %1495 = vmatpush1.bf16.msra.mxu0 %v1494_v29  ;;  %v207_v29 = vld [vmem:[#allocation7 + $0x3e0] sm:$0xff]  ;;  %v254_v33 = vld [vmem:[#allocation7 + $0x558] sm:$0xff] }
  0x9b   :  { %1751 = vmatpush1.bf16.msra.mxu1 %v1750_v30  ;;  %1497 = vmatprep.subr.bf16.mxu0 %v1496_v31  ;;  %v205_v30 = vld [vmem:[#allocation7 + $0x3d0] sm:$0xff]  ;;  %v1772_v31 = vpack.c.bf16 %v210_v24, %v206_v23  ;;  %v1518_v37 = vpack.c.bf16 %v207_v29, %v203_v28  ;;  %v1792_v29 = vpack.c.bf16 %v250_v21, %v246_v20  ;;  %v258_v34 = vld [vmem:[#allocation7 + $0x578] sm:$0xff] }
  0x9c   :  { %1753 = vmatprep.subr.bf16.mxu1 %v1752_v35  ;;  %v214_v35 = vld [vmem:[#allocation7 + $0x418] sm:$0xff]  ;;  %v1774_v38 = vpack.c.bf16 %v209_v32, %v205_v30  ;;  %v245_v28 = vld [vmem:[#allocation7 + $0x510] sm:$0xff]  ;;  %v256_v32 = vld [vmem:[#allocation7 + $0x568] sm:$0xff] }
  0x9d   :  { %v249_v30 = vld [vmem:[#allocation7 + $0x530] sm:$0xff]  ;;  %v262_v45 = vld [vmem:[#allocation7 + $0x598] sm:$0xff] }
  0x9e   :  { %1499 = vmatpush1.bf16.msra.mxu0 %v1498_v41  ;;  %v215_v41 = vld [vmem:[#allocation7 + $0x420] sm:$0xff]  ;;  %v266_v46 = vld [vmem:[#allocation7 + $0x5b8] sm:$0xff] }
  0x9f   :  { %1755 = vmatpush1.bf16.msra.mxu1 %v1754_v42  ;;  %1501 = vmatprep.subr.bf16.mxu0 %v1500_v43  ;;  %v213_v42 = vld [vmem:[#allocation7 + $0x410] sm:$0xff]  ;;  %v1776_v43 = vpack.c.bf16 %v218_v36, %v214_v35  ;;  %v1522_v50 = vpack.c.bf16 %v215_v41, %v211_v40  ;;  %v1794_v36 = vpack.c.bf16 %v249_v30, %v245_v28  ;;  %v296_v28 = vld [vmem:[#allocation7 + $0x6a8] sm:$0xff]  ;;  %v298_v30 = vld [vmem:[#allocation7 + $0x6b8] sm:$0xff] }
  0xa0   :  { %1757 = vmatprep.subr.bf16.mxu1 %v1756_v47  ;;  %v222_v47 = vld [vmem:[#allocation7 + $0x458] sm:$0xff]  ;;  %v1778_v51 = vpack.c.bf16 %v217_v44, %v213_v42  ;;  %v253_v40 = vld [vmem:[#allocation7 + $0x550] sm:$0xff]  ;;  %v1796_v41 = vpack.c.bf16 %v258_v34, %v254_v33  ;;  %v264_v44 = vld [vmem:[#allocation7 + $0x5a8] sm:$0xff] }
  0xa1   :  { %v1780_v56 = vpack.c.bf16 %v226_v48, %v222_v47  ;;  %v257_v42 = vld [vmem:[#allocation7 + $0x570] sm:$0xff]  ;;  %v291_v34 = vld [vmem:[#allocation7 + $0x680] sm:$0xff] }
  0xa2   :  { %1503 = vmatpush1.bf16.msra.mxu0 %v1502_v53  ;;  %v219_v53 = vld [vmem:[#allocation7 + $0x440] sm:$0xff]  ;;  %v1798_v48 = vpack.c.bf16 %v257_v42, %v253_v40  ;;  %v304_v40 = vld [vmem:[#allocation7 + $0x6e8] sm:$0xff]  ;;  %v306_v42 = vld [vmem:[#allocation7 + $0x6f8] sm:$0xff] }
  0xa3   :  { %1759 = vmatpush1.bf16.msra.mxu1 %v1758_v54  ;;  %1505 = vmatprep.subr.bf16.mxu0 %v1504_v55  ;;  %v223_v54 = vld [vmem:[#allocation7 + $0x460] sm:$0xff]  ;;  %v221_v55 = vld [vmem:[#allocation7 + $0x450] sm:$0xff] }
  0xa4   :  { %1761 = vmatprep.subr.bf16.mxu1 %v1760_v59  ;;  %v232_v59 = vld [vmem:[#allocation7 + $0x4a8] sm:$0xff]  ;;  %v1526_v62 = vpack.c.bf16 %v223_v54, %v219_v53  ;;  %v1782_v63 = vpack.c.bf16 %v225_v57, %v221_v55  ;;  %v1800_v53 = vpack.c.bf16 %v266_v46, %v262_v45  ;;  %v265_v54 = vld [vmem:[#allocation7 + $0x5b0] sm:$0xff]  ;;  %v270_v57 = vld [vmem:[#allocation7 + $0x5d8] sm:$0xff] }
  0xa5   :  { %v1528_v0 = vpack.c.bf16 %v232_v59, %v228_v58  ;;  %v268_v55 = vld [vmem:[#allocation7 + $0x5c8] sm:$0xff]  ;;  %v274_v58 = vld [vmem:[#allocation7 + $0x5f8] sm:$0xff]  ;;  %v299_v46 = vld [vmem:[#allocation7 + $0x6c0] sm:$0xff] }
  0xa6   :  { %1507 = vmatpush1.bf16.msra.mxu0 %v1506_v1  ;;  %v227_v1 = vld [vmem:[#allocation7 + $0x480] sm:$0xff] }
  0xa7   :  { %1763 = vmatpush1.bf16.msra.mxu1 %v1762_v2  ;;  %1509 = vmatprep.subr.bf16.mxu0 %v1508_v3  ;;  %v231_v2 = vld [vmem:[#allocation7 + $0x4a0] sm:$0xff]  ;;  %v229_v3 = vld [vmem:[#allocation7 + $0x490] sm:$0xff] }
  0xa8   :  { %1765 = vmatprep.subr.bf16.mxu1 %v1764_v7  ;;  %v240_v7 = vld [vmem:[#allocation7 + $0x4e8] sm:$0xff]  ;;  %v1530_v10 = vpack.c.bf16 %v231_v2, %v227_v1  ;;  %v1786_v11 = vpack.c.bf16 %v233_v5, %v229_v3  ;;  %v1804_v1 = vpack.c.bf16 %v274_v58, %v270_v57  ;;  %v273_v2 = vld [vmem:[#allocation7 + $0x5f0] sm:$0xff]  ;;  %v278_v5 = vld [vmem:[#allocation7 + $0x618] sm:$0xff] }
  0xa9   :  { %v1532_v12 = vpack.c.bf16 %v240_v7, %v236_v6  ;;  %v276_v3 = vld [vmem:[#allocation7 + $0x608] sm:$0xff]  ;;  %v282_v6 = vld [vmem:[#allocation7 + $0x638] sm:$0xff]  ;;  %v307_v58 = vld [vmem:[#allocation7 + $0x700] sm:$0xff] }
  0xaa   :  { %1511 = vmatpush1.bf16.msra.mxu0 %v1510_v13  ;;  %v235_v13 = vld [vmem:[#allocation7 + $0x4c0] sm:$0xff] }
  0xab   :  { %1767 = vmatpush1.bf16.msra.mxu1 %v1766_v14  ;;  %1513 = vmatprep.subr.bf16.mxu0 %v1512_v15  ;;  %v239_v14 = vld [vmem:[#allocation7 + $0x4e0] sm:$0xff]  ;;  %v237_v15 = vld [vmem:[#allocation7 + $0x4d0] sm:$0xff] }
  0xac   :  { %1769 = vmatprep.subr.bf16.mxu1 %v1768_v19  ;;  %v248_v19 = vld [vmem:[#allocation7 + $0x528] sm:$0xff]  ;;  %v1534_v23 = vpack.c.bf16 %v239_v14, %v235_v13  ;;  %v1790_v24 = vpack.c.bf16 %v241_v17, %v237_v15  ;;  %v1808_v13 = vpack.c.bf16 %v282_v6, %v278_v5  ;;  %v281_v14 = vld [vmem:[#allocation7 + $0x630] sm:$0xff]  ;;  %v286_v17 = vld [vmem:[#allocation7 + $0x658] sm:$0xff] }
  0xad   :  { %v284_v15 = vld [vmem:[#allocation7 + $0x648] sm:$0xff]  ;;  %v315_v6 = vld [vmem:[#allocation7 + $0x740] sm:$0xff] }
  0xae   :  { %1515 = vmatpush1.bf16.msra.mxu0 %v1514_v25  ;;  %v1536_v25 = vpack.c.bf16 %v248_v19, %v244_v18  ;;  %v290_v18 = vld [vmem:[#allocation7 + $0x678] sm:$0xff] }
  0xaf   :  { %1771 = vmatpush1.bf16.msra.mxu1 %v1770_v26  ;;  %1517 = vmatprep.subr.bf16.mxu0 %v1516_v27  ;;  %v243_v26 = vld [vmem:[#allocation7 + $0x500] sm:$0xff] }
  0xb0   :  { %1773 = vmatprep.subr.bf16.mxu1 %v1772_v31  ;;  %v247_v27 = vld [vmem:[#allocation7 + $0x520] sm:$0xff]  ;;  %v252_v31 = vld [vmem:[#allocation7 + $0x548] sm:$0xff] }
  0xb1   :  { %v1538_v35 = vpack.c.bf16 %v247_v27, %v243_v26  ;;  %v289_v26 = vld [vmem:[#allocation7 + $0x670] sm:$0xff]  ;;  %v292_v27 = vld [vmem:[#allocation7 + $0x688] sm:$0xff] }
  0xb2   :  { %1519 = vmatpush1.bf16.msra.mxu0 %v1518_v37  ;;  %v1540_v37 = vpack.c.bf16 %v256_v32, %v252_v31  ;;  %v1560_v33 = vpack.c.bf16 %v296_v28, %v292_v27 }
  0xb3   :  { %1775 = vmatpush1.bf16.msra.mxu1 %v1774_v38  ;;  %1521 = vmatprep.subr.bf16.mxu0 %v1520_v39  ;;  %v251_v38 = vld [vmem:[#allocation7 + $0x540] sm:$0xff] }
  0xb4   :  { %1777 = vmatprep.subr.bf16.mxu1 %v1776_v43  ;;  %v255_v39 = vld [vmem:[#allocation7 + $0x560] sm:$0xff]  ;;  %v260_v43 = vld [vmem:[#allocation7 + $0x588] sm:$0xff] }
  0xb5   :  { %867 = vmatmul.mubr.f32.vlgmr.msra.gmra.mrb[0].mxu0 %v75_v49  ;;  %v1542_v47 = vpack.c.bf16 %v255_v39, %v251_v38  ;;  %v297_v38 = vld [vmem:[#allocation7 + $0x6b0] sm:$0xff]  ;;  %v300_v39 = vld [vmem:[#allocation7 + $0x6c8] sm:$0xff] }
  0xb6   :  { %1523 = vmatpush1.bf16.msra.mxu0 %v1522_v50  ;;  %1151 = vmatmul.mubr.f32.vlgmr.msra.gmra.mrb[0].mxu1 %v75_v49  ;;  %v1544_v49 = vpack.c.bf16 %v264_v44, %v260_v43  ;;  %v259_v50 = vld [vmem:[#allocation7 + $0x580] sm:$0xff]  ;;  %v1564_v45 = vpack.c.bf16 %v304_v40, %v300_v39 }
  0xb7   :  { %1779 = vmatpush1.bf16.msra.mxu1 %v1778_v51  ;;  %1525 = vmatprep.subr.bf16.mxu0 %v1524_v52  ;;  %v263_v51 = vld [vmem:[#allocation7 + $0x5a0] sm:$0xff]  ;;  %v261_v52 = vld [vmem:[#allocation7 + $0x590] sm:$0xff] }
  0xb8   :  { %1781 = vmatprep.subr.bf16.mxu1 %v1780_v56  ;;  %937 = vmatprep.mubr.f32.mxu0 %v78_v22  ;;  %v272_v56 = vld [vmem:[#allocation7 + $0x5e8] sm:$0xff]  ;;  %v1546_v59 = vpack.c.bf16 %v263_v51, %v259_v50  ;;  %v1802_v60 = vpack.c.bf16 %v265_v54, %v261_v52  ;;  %v305_v50 = vld [vmem:[#allocation7 + $0x6f0] sm:$0xff]  ;;  %v314_v54 = vld [vmem:[#allocation7 + $0x738] sm:$0xff] }
  0xb9   :  { %1221 = vmatprep.mubr.f32.mxu1 %v78_v22  ;;  %v1548_v61 = vpack.c.bf16 %v272_v56, %v268_v55  ;;  %v283_v22 = vld [vmem:[#allocation7 + $0x640] sm:$0xff]  ;;  %v308_v51 = vld [vmem:[#allocation7 + $0x708] sm:$0xff] }
  0xba   :  { %1527 = vmatpush1.bf16.msra.mxu0 %v1526_v62  ;;  %v267_v62 = vld [vmem:[#allocation7 + $0x5c0] sm:$0xff]  ;;  %v312_v52 = vld [vmem:[#allocation7 + $0x728] sm:$0xff] }
  0xbb   :  { %1783 = vmatpush1.bf16.msra.mxu1 %v1782_v63  ;;  %1529 = vmatprep.subr.bf16.mxu0 %v1528_v0  ;;  %v271_v63 = vld [vmem:[#allocation7 + $0x5e0] sm:$0xff]  ;;  %v269_v0 = vld [vmem:[#allocation7 + $0x5d0] sm:$0xff]  ;;  %v1568_v57 = vpack.c.bf16 %v312_v52, %v308_v51  ;;  %v77_v51 = vld [vmem:[#allocation2 + $0x10] sm:$0xff] }
  0xbc   :  { %1785 = vmatprep.subr.bf16.mxu1 %v1784_v4  ;;  %v280_v4 = vld [vmem:[#allocation7 + $0x628] sm:$0xff]  ;;  %v1550_v7 = vpack.c.bf16 %v271_v63, %v267_v62  ;;  %v1806_v8 = vpack.c.bf16 %v273_v2, %v269_v0  ;;  %v313_v62 = vld [vmem:[#allocation7 + $0x730] sm:$0xff]  ;;  %v322_v2 = vld [vmem:[#allocation7 + $0x778] sm:$0xff] }
  0xbd   :  { %v1552_v9 = vpack.c.bf16 %v280_v4, %v276_v3  ;;  %v316_v63 = vld [vmem:[#allocation7 + $0x748] sm:$0xff] }
  0xbe   :  { %1531 = vmatpush1.bf16.msra.mxu0 %v1530_v10  ;;  %v275_v10 = vld [vmem:[#allocation7 + $0x600] sm:$0xff]  ;;  %v320_v0 = vld [vmem:[#allocation7 + $0x768] sm:$0xff] }
  0xbf   :  { %1787 = vmatpush1.bf16.msra.mxu1 %v1786_v11  ;;  %1533 = vmatprep.subr.bf16.mxu0 %v1532_v12  ;;  %v279_v11 = vld [vmem:[#allocation7 + $0x620] sm:$0xff]  ;;  %v277_v12 = vld [vmem:[#allocation7 + $0x610] sm:$0xff]  ;;  %v1572_v5 = vpack.c.bf16 %v320_v0, %v316_v63  ;;  %v362_v63 = vld [vmem:[#allocation7 + $0x8b8] sm:$0xff] }
  0xc0   :  { %1789 = vmatprep.subr.bf16.mxu1 %v1788_v16  ;;  %v288_v16 = vld [vmem:[#allocation7 + $0x668] sm:$0xff]  ;;  %v1554_v19 = vpack.c.bf16 %v279_v11, %v275_v10  ;;  %v1810_v20 = vpack.c.bf16 %v281_v14, %v277_v12  ;;  %v321_v10 = vld [vmem:[#allocation7 + $0x770] sm:$0xff]  ;;  %v330_v14 = vld [vmem:[#allocation7 + $0x7b8] sm:$0xff] }
  0xc1   :  { %v1556_v21 = vpack.c.bf16 %v288_v16, %v284_v15  ;;  %v324_v11 = vld [vmem:[#allocation7 + $0x788] sm:$0xff]  ;;  %v80_v0 = vld [vmem:[#allocation2 + $0x28] sm:$0xff] }
  0xc2   :  { %1535 = vmatpush1.bf16.msra.mxu0 %v1534_v23  ;;  %v287_v23 = vld [vmem:[#allocation7 + $0x660] sm:$0xff]  ;;  %v328_v12 = vld [vmem:[#allocation7 + $0x7a8] sm:$0xff] }
  0xc3   :  { %1791 = vmatpush1.bf16.msra.mxu1 %v1790_v24  ;;  %1537 = vmatprep.subr.bf16.mxu0 %v1536_v25  ;;  %v285_v24 = vld [vmem:[#allocation7 + $0x650] sm:$0xff]  ;;  %v1812_v25 = vpack.c.bf16 %v290_v18, %v286_v17  ;;  %v1558_v31 = vpack.c.bf16 %v287_v23, %v283_v22  ;;  %v1576_v17 = vpack.c.bf16 %v328_v12, %v324_v11  ;;  %v323_v18 = vld [vmem:[#allocation7 + $0x780] sm:$0xff]  ;;  %v332_v23 = vld [vmem:[#allocation7 + $0x7c8] sm:$0xff] }
  0xc4   :  { %1793 = vmatprep.subr.bf16.mxu1 %v1792_v29  ;;  %v294_v29 = vld [vmem:[#allocation7 + $0x698] sm:$0xff]  ;;  %v1814_v32 = vpack.c.bf16 %v289_v26, %v285_v24  ;;  %v329_v22 = vld [vmem:[#allocation7 + $0x7b0] sm:$0xff]  ;;  %v336_v24 = vld [vmem:[#allocation7 + $0x7e8] sm:$0xff] }
  0xc5   :  { %v338_v26 = vld [vmem:[#allocation7 + $0x7f8] sm:$0xff] }
  0xc6   :  { %1539 = vmatpush1.bf16.msra.mxu0 %v1538_v35  ;;  %v295_v35 = vld [vmem:[#allocation7 + $0x6a0] sm:$0xff]  ;;  %v366_v11 = vld [vmem:[#allocation7 + $0x8d8] sm:$0xff] }
  0xc7   :  { %1795 = vmatpush1.bf16.msra.mxu1 %v1794_v36  ;;  %1541 = vmatprep.subr.bf16.mxu0 %v1540_v37  ;;  %v293_v36 = vld [vmem:[#allocation7 + $0x690] sm:$0xff]  ;;  %v1816_v37 = vpack.c.bf16 %v298_v30, %v294_v29  ;;  %v1562_v43 = vpack.c.bf16 %v295_v35, %v291_v34  ;;  %v1580_v29 = vpack.c.bf16 %v336_v24, %v332_v23  ;;  %v331_v30 = vld [vmem:[#allocation7 + $0x7c0] sm:$0xff]  ;;  %v340_v35 = vld [vmem:[#allocation7 + $0x808] sm:$0xff] }
  0xc8   :  { %1797 = vmatprep.subr.bf16.mxu1 %v1796_v41  ;;  %v302_v41 = vld [vmem:[#allocation7 + $0x6d8] sm:$0xff]  ;;  %v1818_v44 = vpack.c.bf16 %v297_v38, %v293_v36  ;;  %v337_v34 = vld [vmem:[#allocation7 + $0x7f0] sm:$0xff]  ;;  %v344_v36 = vld [vmem:[#allocation7 + $0x828] sm:$0xff] }
  0xc9   :  { %v346_v38 = vld [vmem:[#allocation7 + $0x838] sm:$0xff] }
  0xca   :  { %1543 = vmatpush1.bf16.msra.mxu0 %v1542_v47  ;;  %v303_v47 = vld [vmem:[#allocation7 + $0x6e0] sm:$0xff]  ;;  %v370_v12 = vld [vmem:[#allocation7 + $0x8f8] sm:$0xff] }
  0xcb   :  { %1799 = vmatpush1.bf16.msra.mxu1 %v1798_v48  ;;  %1545 = vmatprep.subr.bf16.mxu0 %v1544_v49  ;;  %v301_v48 = vld [vmem:[#allocation7 + $0x6d0] sm:$0xff]  ;;  %v1820_v49 = vpack.c.bf16 %v306_v42, %v302_v41  ;;  %v1566_v55 = vpack.c.bf16 %v303_v47, %v299_v46  ;;  %v1584_v41 = vpack.c.bf16 %v344_v36, %v340_v35  ;;  %v339_v42 = vld [vmem:[#allocation7 + $0x800] sm:$0xff]  ;;  %v348_v47 = vld [vmem:[#allocation7 + $0x848] sm:$0xff] }
  0xcc   :  { %1801 = vmatprep.subr.bf16.mxu1 %v1800_v53  ;;  %v310_v53 = vld [vmem:[#allocation7 + $0x718] sm:$0xff]  ;;  %v1822_v56 = vpack.c.bf16 %v305_v50, %v301_v48  ;;  %v345_v46 = vld [vmem:[#allocation7 + $0x830] sm:$0xff]  ;;  %v352_v48 = vld [vmem:[#allocation7 + $0x868] sm:$0xff] }
  0xcd   :  { %v354_v50 = vld [vmem:[#allocation7 + $0x878] sm:$0xff] }
  0xce   :  { %1547 = vmatpush1.bf16.msra.mxu0 %v1546_v59  ;;  %v311_v59 = vld [vmem:[#allocation7 + $0x720] sm:$0xff]  ;;  %v374_v23 = vld [vmem:[#allocation7 + $0x918] sm:$0xff] }
  0xcf   :  { %1803 = vmatpush1.bf16.msra.mxu1 %v1802_v60  ;;  %1549 = vmatprep.subr.bf16.mxu0 %v1548_v61  ;;  %v309_v60 = vld [vmem:[#allocation7 + $0x710] sm:$0xff]  ;;  %v1824_v61 = vpack.c.bf16 %v314_v54, %v310_v53  ;;  %v1570_v3 = vpack.c.bf16 %v311_v59, %v307_v58  ;;  %v1588_v54 = vpack.c.bf16 %v352_v48, %v348_v47  ;;  %v378_v24 = vld [vmem:[#allocation7 + $0x938] sm:$0xff] }
  0xd0   :  { %1805 = vmatprep.subr.bf16.mxu1 %v1804_v1  ;;  %v318_v1 = vld [vmem:[#allocation7 + $0x758] sm:$0xff]  ;;  %v1826_v4 = vpack.c.bf16 %v313_v62, %v309_v60  ;;  %v353_v59 = vld [vmem:[#allocation7 + $0x870] sm:$0xff]  ;;  %v356_v60 = vld [vmem:[#allocation7 + $0x888] sm:$0xff] }
  0xd1   :  { %v358_v62 = vld [vmem:[#allocation7 + $0x898] sm:$0xff] }
  0xd2   :  { %1551 = vmatpush1.bf16.msra.mxu0 %v1550_v7  ;;  %v319_v7 = vld [vmem:[#allocation7 + $0x760] sm:$0xff]  ;;  %v382_v35 = vld [vmem:[#allocation7 + $0x958] sm:$0xff] }
  0xd3   :  { %1807 = vmatpush1.bf16.msra.mxu1 %v1806_v8  ;;  %1553 = vmatprep.subr.bf16.mxu0 %v1552_v9  ;;  %v317_v8 = vld [vmem:[#allocation7 + $0x750] sm:$0xff]  ;;  %v1828_v9 = vpack.c.bf16 %v322_v2, %v318_v1  ;;  %v1574_v15 = vpack.c.bf16 %v319_v7, %v315_v6  ;;  %v1848_v7 = vpack.c.bf16 %v362_v63, %v358_v62  ;;  %v386_v36 = vld [vmem:[#allocation7 + $0x978] sm:$0xff] }
  0xd4   :  { %1809 = vmatprep.subr.bf16.mxu1 %v1808_v13  ;;  %v326_v13 = vld [vmem:[#allocation7 + $0x798] sm:$0xff]  ;;  %v1830_v16 = vpack.c.bf16 %v321_v10, %v317_v8  ;;  %v357_v6 = vld [vmem:[#allocation7 + $0x890] sm:$0xff]  ;;  %v368_v10 = vld [vmem:[#allocation7 + $0x8e8] sm:$0xff] }
  0xd5   :  { %v361_v8 = vld [vmem:[#allocation7 + $0x8b0] sm:$0xff]  ;;  %v390_v47 = vld [vmem:[#allocation7 + $0x998] sm:$0xff] }
  0xd6   :  { %1555 = vmatpush1.bf16.msra.mxu0 %v1554_v19  ;;  %v327_v19 = vld [vmem:[#allocation7 + $0x7a0] sm:$0xff]  ;;  %v394_v48 = vld [vmem:[#allocation7 + $0x9b8] sm:$0xff] }
  0xd7   :  { %1811 = vmatpush1.bf16.msra.mxu1 %v1810_v20  ;;  %1557 = vmatprep.subr.bf16.mxu0 %v1556_v21  ;;  %v325_v20 = vld [vmem:[#allocation7 + $0x790] sm:$0xff]  ;;  %v1832_v21 = vpack.c.bf16 %v330_v14, %v326_v13  ;;  %v1578_v27 = vpack.c.bf16 %v327_v19, %v323_v18  ;;  %v1850_v14 = vpack.c.bf16 %v361_v8, %v357_v6  ;;  %v408_v6 = vld [vmem:[#allocation7 + $0xa28] sm:$0xff]  ;;  %v410_v8 = vld [vmem:[#allocation7 + $0xa38] sm:$0xff] }
  0xd8   :  { %1813 = vmatprep.subr.bf16.mxu1 %v1812_v25  ;;  %v334_v25 = vld [vmem:[#allocation7 + $0x7d8] sm:$0xff]  ;;  %v1834_v28 = vpack.c.bf16 %v329_v22, %v325_v20  ;;  %v365_v18 = vld [vmem:[#allocation7 + $0x8d0] sm:$0xff]  ;;  %v1852_v19 = vpack.c.bf16 %v370_v12, %v366_v11  ;;  %v376_v22 = vld [vmem:[#allocation7 + $0x928] sm:$0xff] }
  0xd9   :  { %v369_v20 = vld [vmem:[#allocation7 + $0x8f0] sm:$0xff]  ;;  %v403_v12 = vld [vmem:[#allocation7 + $0xa00] sm:$0xff] }
  0xda   :  { %1559 = vmatpush1.bf16.msra.mxu0 %v1558_v31  ;;  %v335_v31 = vld [vmem:[#allocation7 + $0x7e0] sm:$0xff] }
  0xdb   :  { %1815 = vmatpush1.bf16.msra.mxu1 %v1814_v32  ;;  %1561 = vmatprep.subr.bf16.mxu0 %v1560_v33  ;;  %v333_v32 = vld [vmem:[#allocation7 + $0x7d0] sm:$0xff]  ;;  %v1836_v33 = vpack.c.bf16 %v338_v26, %v334_v25  ;;  %v1582_v39 = vpack.c.bf16 %v335_v31, %v331_v30  ;;  %v1854_v26 = vpack.c.bf16 %v369_v20, %v365_v18  ;;  %v416_v18 = vld [vmem:[#allocation7 + $0xa68] sm:$0xff]  ;;  %v418_v20 = vld [vmem:[#allocation7 + $0xa78] sm:$0xff] }
  0xdc   :  { %1817 = vmatprep.subr.bf16.mxu1 %v1816_v37  ;;  %v342_v37 = vld [vmem:[#allocation7 + $0x818] sm:$0xff]  ;;  %v1838_v40 = vpack.c.bf16 %v337_v34, %v333_v32  ;;  %v373_v30 = vld [vmem:[#allocation7 + $0x910] sm:$0xff]  ;;  %v1856_v31 = vpack.c.bf16 %v378_v24, %v374_v23  ;;  %v384_v34 = vld [vmem:[#allocation7 + $0x968] sm:$0xff] }
  0xdd   :  { %v377_v32 = vld [vmem:[#allocation7 + $0x930] sm:$0xff]  ;;  %v411_v24 = vld [vmem:[#allocation7 + $0xa40] sm:$0xff] }
  0xde   :  { %1563 = vmatpush1.bf16.msra.mxu0 %v1562_v43  ;;  %v343_v43 = vld [vmem:[#allocation7 + $0x820] sm:$0xff] }
  0xdf   :  { %1819 = vmatpush1.bf16.msra.mxu1 %v1818_v44  ;;  %1565 = vmatprep.subr.bf16.mxu0 %v1564_v45  ;;  %v341_v44 = vld [vmem:[#allocation7 + $0x810] sm:$0xff]  ;;  %v1840_v45 = vpack.c.bf16 %v346_v38, %v342_v37  ;;  %v1586_v52 = vpack.c.bf16 %v343_v43, %v339_v42  ;;  %v1858_v38 = vpack.c.bf16 %v377_v32, %v373_v30  ;;  %v424_v30 = vld [vmem:[#allocation7 + $0xaa8] sm:$0xff]  ;;  %v426_v32 = vld [vmem:[#allocation7 + $0xab8] sm:$0xff] }
  0xe0   :  { %1821 = vmatprep.subr.bf16.mxu1 %v1820_v49  ;;  %v350_v49 = vld [vmem:[#allocation7 + $0x858] sm:$0xff]  ;;  %v1842_v53 = vpack.c.bf16 %v345_v46, %v341_v44  ;;  %v381_v42 = vld [vmem:[#allocation7 + $0x950] sm:$0xff]  ;;  %v1860_v43 = vpack.c.bf16 %v386_v36, %v382_v35  ;;  %v392_v46 = vld [vmem:[#allocation7 + $0x9a8] sm:$0xff] }
  0xe1   :  { %v1844_v58 = vpack.c.bf16 %v354_v50, %v350_v49  ;;  %v385_v44 = vld [vmem:[#allocation7 + $0x970] sm:$0xff]  ;;  %v419_v36 = vld [vmem:[#allocation7 + $0xa80] sm:$0xff] }
  0xe2   :  { %1567 = vmatpush1.bf16.msra.mxu0 %v1566_v55  ;;  %v347_v55 = vld [vmem:[#allocation7 + $0x840] sm:$0xff]  ;;  %v1862_v50 = vpack.c.bf16 %v385_v44, %v381_v42  ;;  %v432_v42 = vld [vmem:[#allocation7 + $0xae8] sm:$0xff]  ;;  %v434_v44 = vld [vmem:[#allocation7 + $0xaf8] sm:$0xff] }
  0xe3   :  { %1823 = vmatpush1.bf16.msra.mxu1 %v1822_v56  ;;  %1569 = vmatprep.subr.bf16.mxu0 %v1568_v57  ;;  %v351_v56 = vld [vmem:[#allocation7 + $0x860] sm:$0xff]  ;;  %v349_v57 = vld [vmem:[#allocation7 + $0x850] sm:$0xff] }
  0xe4   :  { %1825 = vmatprep.subr.bf16.mxu1 %v1824_v61  ;;  %v360_v61 = vld [vmem:[#allocation7 + $0x8a8] sm:$0xff]  ;;  %v1590_v1 = vpack.c.bf16 %v351_v56, %v347_v55  ;;  %v1846_v2 = vpack.c.bf16 %v353_v59, %v349_v57  ;;  %v1864_v55 = vpack.c.bf16 %v394_v48, %v390_v47  ;;  %v393_v56 = vld [vmem:[#allocation7 + $0x9b0] sm:$0xff]  ;;  %v398_v59 = vld [vmem:[#allocation7 + $0x9d8] sm:$0xff] }
  0xe5   :  { %v396_v57 = vld [vmem:[#allocation7 + $0x9c8] sm:$0xff]  ;;  %v427_v48 = vld [vmem:[#allocation7 + $0xac0] sm:$0xff] }
  0xe6   :  { %1571 = vmatpush1.bf16.msra.mxu0 %v1570_v3  ;;  %v1592_v3 = vpack.c.bf16 %v360_v61, %v356_v60  ;;  %v402_v60 = vld [vmem:[#allocation7 + $0x9f8] sm:$0xff] }
  0xe7   :  { %1827 = vmatpush1.bf16.msra.mxu1 %v1826_v4  ;;  %1573 = vmatprep.subr.bf16.mxu0 %v1572_v5  ;;  %v355_v4 = vld [vmem:[#allocation7 + $0x880] sm:$0xff] }
  0xe8   :  { %1829 = vmatprep.subr.bf16.mxu1 %v1828_v9  ;;  %v359_v5 = vld [vmem:[#allocation7 + $0x8a0] sm:$0xff]  ;;  %v364_v9 = vld [vmem:[#allocation7 + $0x8c8] sm:$0xff] }
  0xe9   :  { %v1594_v13 = vpack.c.bf16 %v359_v5, %v355_v4  ;;  %v401_v4 = vld [vmem:[#allocation7 + $0x9f0] sm:$0xff]  ;;  %v404_v5 = vld [vmem:[#allocation7 + $0xa08] sm:$0xff] }
  0xea   :  { %1575 = vmatpush1.bf16.msra.mxu0 %v1574_v15  ;;  %v1596_v15 = vpack.c.bf16 %v368_v10, %v364_v9  ;;  %v1616_v11 = vpack.c.bf16 %v408_v6, %v404_v5 }
  0xeb   :  { %1831 = vmatpush1.bf16.msra.mxu1 %v1830_v16  ;;  %1577 = vmatprep.subr.bf16.mxu0 %v1576_v17  ;;  %v363_v16 = vld [vmem:[#allocation7 + $0x8c0] sm:$0xff] }
  0xec   :  { %1833 = vmatprep.subr.bf16.mxu1 %v1832_v21  ;;  %v367_v17 = vld [vmem:[#allocation7 + $0x8e0] sm:$0xff]  ;;  %v372_v21 = vld [vmem:[#allocation7 + $0x908] sm:$0xff] }
  0xed   :  { %v1598_v25 = vpack.c.bf16 %v367_v17, %v363_v16  ;;  %v409_v16 = vld [vmem:[#allocation7 + $0xa30] sm:$0xff]  ;;  %v412_v17 = vld [vmem:[#allocation7 + $0xa48] sm:$0xff] }
  0xee   :  { %1579 = vmatpush1.bf16.msra.mxu0 %v1578_v27  ;;  %v1600_v27 = vpack.c.bf16 %v376_v22, %v372_v21  ;;  %v1620_v23 = vpack.c.bf16 %v416_v18, %v412_v17 }
  0xef   :  { %1835 = vmatpush1.bf16.msra.mxu1 %v1834_v28  ;;  %1581 = vmatprep.subr.bf16.mxu0 %v1580_v29  ;;  %v371_v28 = vld [vmem:[#allocation7 + $0x900] sm:$0xff] }
  0xf0   :  { %1837 = vmatprep.subr.bf16.mxu1 %v1836_v33  ;;  %v375_v29 = vld [vmem:[#allocation7 + $0x920] sm:$0xff]  ;;  %v380_v33 = vld [vmem:[#allocation7 + $0x948] sm:$0xff] }
  0xf1   :  { %v1602_v37 = vpack.c.bf16 %v375_v29, %v371_v28  ;;  %v417_v28 = vld [vmem:[#allocation7 + $0xa70] sm:$0xff]  ;;  %v420_v29 = vld [vmem:[#allocation7 + $0xa88] sm:$0xff] }
  0xf2   :  { %1583 = vmatpush1.bf16.msra.mxu0 %v1582_v39  ;;  %v1604_v39 = vpack.c.bf16 %v384_v34, %v380_v33  ;;  %v1624_v35 = vpack.c.bf16 %v424_v30, %v420_v29 }
  0xf3   :  { %1839 = vmatpush1.bf16.msra.mxu1 %v1838_v40  ;;  %1585 = vmatprep.subr.bf16.mxu0 %v1584_v41  ;;  %v379_v40 = vld [vmem:[#allocation7 + $0x940] sm:$0xff] }
  0xf4   :  { %1841 = vmatprep.subr.bf16.mxu1 %v1840_v45  ;;  %v383_v41 = vld [vmem:[#allocation7 + $0x960] sm:$0xff]  ;;  %v388_v45 = vld [vmem:[#allocation7 + $0x988] sm:$0xff] }
  0xf5   :  { %938 = vmatmul.mubr.f32.vlgmr.msra.gmra.mrb[0].mxu0 %v77_v51  ;;  %v1606_v49 = vpack.c.bf16 %v383_v41, %v379_v40  ;;  %v425_v40 = vld [vmem:[#allocation7 + $0xab0] sm:$0xff]  ;;  %v428_v41 = vld [vmem:[#allocation7 + $0xac8] sm:$0xff] }
  0xf6   :  { %1587 = vmatpush1.bf16.msra.mxu0 %v1586_v52  ;;  %1222 = vmatmul.mubr.f32.vlgmr.msra.gmra.mrb[0].mxu1 %v77_v51  ;;  %v1608_v51 = vpack.c.bf16 %v392_v46, %v388_v45  ;;  %v387_v52 = vld [vmem:[#allocation7 + $0x980] sm:$0xff]  ;;  %v1628_v47 = vpack.c.bf16 %v432_v42, %v428_v41 }
  0xf7   :  { %1843 = vmatpush1.bf16.msra.mxu1 %v1842_v53  ;;  %1589 = vmatprep.subr.bf16.mxu0 %v1588_v54  ;;  %v391_v53 = vld [vmem:[#allocation7 + $0x9a0] sm:$0xff]  ;;  %v389_v54 = vld [vmem:[#allocation7 + $0x990] sm:$0xff] }
  0xf8   :  { %1845 = vmatprep.subr.bf16.mxu1 %v1844_v58  ;;  %1008 = vmatprep.mubr.f32.mxu0 %v80_v0  ;;  %v400_v58 = vld [vmem:[#allocation7 + $0x9e8] sm:$0xff]  ;;  %v1610_v61 = vpack.c.bf16 %v391_v53, %v387_v52  ;;  %v1866_v62 = vpack.c.bf16 %v393_v56, %v389_v54  ;;  %v433_v52 = vld [vmem:[#allocation7 + $0xaf0] sm:$0xff]  ;;  %v442_v56 = vld [vmem:[#allocation7 + $0xb38] sm:$0xff] }
  0xf9   :  { %1292 = vmatprep.mubr.f32.mxu1 %v80_v0  ;;  %v1612_v63 = vpack.c.bf16 %v400_v58, %v396_v57  ;;  %v395_v0 = vld [vmem:[#allocation7 + $0x9c0] sm:$0xff]  ;;  %v436_v53 = vld [vmem:[#allocation7 + $0xb08] sm:$0xff] }
  0xfa   :  { %1591 = vmatpush1.bf16.msra.mxu0 %v1590_v1  ;;  %v399_v1 = vld [vmem:[#allocation7 + $0x9e0] sm:$0xff]  ;;  %v440_v54 = vld [vmem:[#allocation7 + $0xb28] sm:$0xff] }
  0xfb   :  { %1847 = vmatpush1.bf16.msra.mxu1 %v1846_v2  ;;  %1593 = vmatprep.subr.bf16.mxu0 %v1592_v3  ;;  %v397_v2 = vld [vmem:[#allocation7 + $0x9d0] sm:$0xff]  ;;  %v1868_v3 = vpack.c.bf16 %v402_v60, %v398_v59  ;;  %v1614_v9 = vpack.c.bf16 %v399_v1, %v395_v0  ;;  %v1632_v59 = vpack.c.bf16 %v440_v54, %v436_v53  ;;  %v435_v60 = vld [vmem:[#allocation7 + $0xb00] sm:$0xff]  ;;  %v444_v1 = vld [vmem:[#allocation7 + $0xb48] sm:$0xff] }
  0xfc   :  { %1849 = vmatprep.subr.bf16.mxu1 %v1848_v7  ;;  %v406_v7 = vld [vmem:[#allocation7 + $0xa18] sm:$0xff]  ;;  %v1870_v10 = vpack.c.bf16 %v401_v4, %v397_v2  ;;  %v441_v0 = vld [vmem:[#allocation7 + $0xb30] sm:$0xff]  ;;  %v448_v2 = vld [vmem:[#allocation7 + $0xb68] sm:$0xff] }
  0xfd   :  { %v450_v4 = vld [vmem:[#allocation7 + $0xb78] sm:$0xff] }
  0xfe   :  { %1595 = vmatpush1.bf16.msra.mxu0 %v1594_v13  ;;  %v407_v13 = vld [vmem:[#allocation7 + $0xa20] sm:$0xff]  ;;  %v79_v53 = vld [vmem:[#allocation2 + $0x20] sm:$0xff] }
  0xff   :  { %1851 = vmatpush1.bf16.msra.mxu1 %v1850_v14  ;;  %1597 = vmatprep.subr.bf16.mxu0 %v1596_v15  ;;  %v405_v14 = vld [vmem:[#allocation7 + $0xa10] sm:$0xff]  ;;  %v1872_v15 = vpack.c.bf16 %v410_v8, %v406_v7  ;;  %v1618_v21 = vpack.c.bf16 %v407_v13, %v403_v12  ;;  %v1636_v7 = vpack.c.bf16 %v448_v2, %v444_v1  ;;  %v443_v8 = vld [vmem:[#allocation7 + $0xb40] sm:$0xff]  ;;  %v452_v13 = vld [vmem:[#allocation7 + $0xb88] sm:$0xff] }
 0x100   :  { %1853 = vmatprep.subr.bf16.mxu1 %v1852_v19  ;;  %v414_v19 = vld [vmem:[#allocation7 + $0xa58] sm:$0xff]  ;;  %v1874_v22 = vpack.c.bf16 %v409_v16, %v405_v14  ;;  %v449_v12 = vld [vmem:[#allocation7 + $0xb70] sm:$0xff]  ;;  %v456_v14 = vld [vmem:[#allocation7 + $0xba8] sm:$0xff] }
 0x101   :  { %v458_v16 = vld [vmem:[#allocation7 + $0xbb8] sm:$0xff]  ;;  %v82_v2 = vld [vmem:[#allocation2 + $0x38] sm:$0xff] }
 0x102   :  { %1599 = vmatpush1.bf16.msra.mxu0 %v1598_v25  ;;  %v415_v25 = vld [vmem:[#allocation7 + $0xa60] sm:$0xff]  ;;  %v490_v1 = vld [vmem:[#allocation7 + $0xcb8] sm:$0xff] }
 0x103   :  { %1855 = vmatpush1.bf16.msra.mxu1 %v1854_v26  ;;  %1601 = vmatprep.subr.bf16.mxu0 %v1600_v27  ;;  %v413_v26 = vld [vmem:[#allocation7 + $0xa50] sm:$0xff]  ;;  %v1876_v27 = vpack.c.bf16 %v418_v20, %v414_v19  ;;  %v1622_v33 = vpack.c.bf16 %v415_v25, %v411_v24  ;;  %v1640_v19 = vpack.c.bf16 %v456_v14, %v452_v13  ;;  %v451_v20 = vld [vmem:[#allocation7 + $0xb80] sm:$0xff]  ;;  %v460_v25 = vld [vmem:[#allocation7 + $0xbc8] sm:$0xff] }
 0x104   :  { %1857 = vmatprep.subr.bf16.mxu1 %v1856_v31  ;;  %v422_v31 = vld [vmem:[#allocation7 + $0xa98] sm:$0xff]  ;;  %v1878_v34 = vpack.c.bf16 %v417_v28, %v413_v26  ;;  %v457_v24 = vld [vmem:[#allocation7 + $0xbb0] sm:$0xff]  ;;  %v464_v26 = vld [vmem:[#allocation7 + $0xbe8] sm:$0xff] }
 0x105   :  { %v466_v28 = vld [vmem:[#allocation7 + $0xbf8] sm:$0xff] }
 0x106   :  { %1603 = vmatpush1.bf16.msra.mxu0 %v1602_v37  ;;  %v423_v37 = vld [vmem:[#allocation7 + $0xaa0] sm:$0xff]  ;;  %v494_v13 = vld [vmem:[#allocation7 + $0xcd8] sm:$0xff] }
 0x107   :  { %1859 = vmatpush1.bf16.msra.mxu1 %v1858_v38  ;;  %1605 = vmatprep.subr.bf16.mxu0 %v1604_v39  ;;  %v421_v38 = vld [vmem:[#allocation7 + $0xa90] sm:$0xff]  ;;  %v1880_v39 = vpack.c.bf16 %v426_v32, %v422_v31  ;;  %v1626_v45 = vpack.c.bf16 %v423_v37, %v419_v36  ;;  %v1644_v31 = vpack.c.bf16 %v464_v26, %v460_v25  ;;  %v459_v32 = vld [vmem:[#allocation7 + $0xbc0] sm:$0xff]  ;;  %v468_v37 = vld [vmem:[#allocation7 + $0xc08] sm:$0xff] }
 0x108   :  { %1861 = vmatprep.subr.bf16.mxu1 %v1860_v43  ;;  %v430_v43 = vld [vmem:[#allocation7 + $0xad8] sm:$0xff]  ;;  %v1882_v46 = vpack.c.bf16 %v425_v40, %v421_v38  ;;  %v465_v36 = vld [vmem:[#allocation7 + $0xbf0] sm:$0xff]  ;;  %v472_v38 = vld [vmem:[#allocation7 + $0xc28] sm:$0xff] }
 0x109   :  { %v474_v40 = vld [vmem:[#allocation7 + $0xc38] sm:$0xff] }
 0x10a   :  { %1607 = vmatpush1.bf16.msra.mxu0 %v1606_v49  ;;  %v431_v49 = vld [vmem:[#allocation7 + $0xae0] sm:$0xff]  ;;  %v498_v14 = vld [vmem:[#allocation7 + $0xcf8] sm:$0xff] }
 0x10b   :  { %1863 = vmatpush1.bf16.msra.mxu1 %v1862_v50  ;;  %1609 = vmatprep.subr.bf16.mxu0 %v1608_v51  ;;  %v429_v50 = vld [vmem:[#allocation7 + $0xad0] sm:$0xff]  ;;  %v1884_v51 = vpack.c.bf16 %v434_v44, %v430_v43  ;;  %v1630_v57 = vpack.c.bf16 %v431_v49, %v427_v48  ;;  %v1648_v43 = vpack.c.bf16 %v472_v38, %v468_v37  ;;  %v467_v44 = vld [vmem:[#allocation7 + $0xc00] sm:$0xff]  ;;  %v476_v49 = vld [vmem:[#allocation7 + $0xc48] sm:$0xff] }
 0x10c   :  { %1865 = vmatprep.subr.bf16.mxu1 %v1864_v55  ;;  %v438_v55 = vld [vmem:[#allocation7 + $0xb18] sm:$0xff]  ;;  %v1886_v58 = vpack.c.bf16 %v433_v52, %v429_v50  ;;  %v473_v48 = vld [vmem:[#allocation7 + $0xc30] sm:$0xff]  ;;  %v480_v50 = vld [vmem:[#allocation7 + $0xc68] sm:$0xff] }
 0x10d   :  { %v482_v52 = vld [vmem:[#allocation7 + $0xc78] sm:$0xff] }
 0x10e   :  { %1611 = vmatpush1.bf16.msra.mxu0 %v1610_v61  ;;  %v439_v61 = vld [vmem:[#allocation7 + $0xb20] sm:$0xff]  ;;  %v502_v25 = vld [vmem:[#allocation7 + $0xd18] sm:$0xff] }
 0x10f   :  { %1867 = vmatpush1.bf16.msra.mxu1 %v1866_v62  ;;  %1613 = vmatprep.subr.bf16.mxu0 %v1612_v63  ;;  %v437_v62 = vld [vmem:[#allocation7 + $0xb10] sm:$0xff]  ;;  %v1888_v63 = vpack.c.bf16 %v442_v56, %v438_v55  ;;  %v1634_v5 = vpack.c.bf16 %v439_v61, %v435_v60  ;;  %v1652_v56 = vpack.c.bf16 %v480_v50, %v476_v49  ;;  %v506_v26 = vld [vmem:[#allocation7 + $0xd38] sm:$0xff] }
 0x110   :  { %1869 = vmatprep.subr.bf16.mxu1 %v1868_v3  ;;  %v446_v3 = vld [vmem:[#allocation7 + $0xb58] sm:$0xff]  ;;  %v1890_v6 = vpack.c.bf16 %v441_v0, %v437_v62  ;;  %v481_v61 = vld [vmem:[#allocation7 + $0xc70] sm:$0xff]  ;;  %v484_v62 = vld [vmem:[#allocation7 + $0xc88] sm:$0xff] }
 0x111   :  { %v486_v0 = vld [vmem:[#allocation7 + $0xc98] sm:$0xff] }
 0x112   :  { %1615 = vmatpush1.bf16.msra.mxu0 %v1614_v9  ;;  %v447_v9 = vld [vmem:[#allocation7 + $0xb60] sm:$0xff]  ;;  %v510_v37 = vld [vmem:[#allocation7 + $0xd58] sm:$0xff] }
 0x113   :  { %1871 = vmatpush1.bf16.msra.mxu1 %v1870_v10  ;;  %1617 = vmatprep.subr.bf16.mxu0 %v1616_v11  ;;  %v445_v10 = vld [vmem:[#allocation7 + $0xb50] sm:$0xff]  ;;  %v1892_v11 = vpack.c.bf16 %v450_v4, %v446_v3  ;;  %v1638_v17 = vpack.c.bf16 %v447_v9, %v443_v8  ;;  %v1912_v9 = vpack.c.bf16 %v490_v1, %v486_v0  ;;  %v514_v38 = vld [vmem:[#allocation7 + $0xd78] sm:$0xff] }
 0x114   :  { %1873 = vmatprep.subr.bf16.mxu1 %v1872_v15  ;;  %v454_v15 = vld [vmem:[#allocation7 + $0xb98] sm:$0xff]  ;;  %v1894_v18 = vpack.c.bf16 %v449_v12, %v445_v10  ;;  %v485_v8 = vld [vmem:[#allocation7 + $0xc90] sm:$0xff]  ;;  %v496_v12 = vld [vmem:[#allocation7 + $0xce8] sm:$0xff] }
 0x115   :  { %v489_v10 = vld [vmem:[#allocation7 + $0xcb0] sm:$0xff]  ;;  %v518_v49 = vld [vmem:[#allocation7 + $0xd98] sm:$0xff] }
 0x116   :  { %1619 = vmatpush1.bf16.msra.mxu0 %v1618_v21  ;;  %v455_v21 = vld [vmem:[#allocation7 + $0xba0] sm:$0xff]  ;;  %v522_v50 = vld [vmem:[#allocation7 + $0xdb8] sm:$0xff] }
 0x117   :  { %1875 = vmatpush1.bf16.msra.mxu1 %v1874_v22  ;;  %1621 = vmatprep.subr.bf16.mxu0 %v1620_v23  ;;  %v453_v22 = vld [vmem:[#allocation7 + $0xb90] sm:$0xff]  ;;  %v1896_v23 = vpack.c.bf16 %v458_v16, %v454_v15  ;;  %v1642_v29 = vpack.c.bf16 %v455_v21, %v451_v20  ;;  %v1914_v16 = vpack.c.bf16 %v489_v10, %v485_v8  ;;  %v536_v8 = vld [vmem:[#allocation7 + $0xe28] sm:$0xff]  ;;  %v538_v10 = vld [vmem:[#allocation7 + $0xe38] sm:$0xff] }
 0x118   :  { %1877 = vmatprep.subr.bf16.mxu1 %v1876_v27  ;;  %v462_v27 = vld [vmem:[#allocation7 + $0xbd8] sm:$0xff]  ;;  %v1898_v30 = vpack.c.bf16 %v457_v24, %v453_v22  ;;  %v493_v20 = vld [vmem:[#allocation7 + $0xcd0] sm:$0xff]  ;;  %v1916_v21 = vpack.c.bf16 %v498_v14, %v494_v13  ;;  %v504_v24 = vld [vmem:[#allocation7 + $0xd28] sm:$0xff] }
 0x119   :  { %v497_v22 = vld [vmem:[#allocation7 + $0xcf0] sm:$0xff]  ;;  %v531_v14 = vld [vmem:[#allocation7 + $0xe00] sm:$0xff] }
 0x11a   :  { %1623 = vmatpush1.bf16.msra.mxu0 %v1622_v33  ;;  %v463_v33 = vld [vmem:[#allocation7 + $0xbe0] sm:$0xff] }
 0x11b   :  { %1879 = vmatpush1.bf16.msra.mxu1 %v1878_v34  ;;  %1625 = vmatprep.subr.bf16.mxu0 %v1624_v35  ;;  %v461_v34 = vld [vmem:[#allocation7 + $0xbd0] sm:$0xff]  ;;  %v1900_v35 = vpack.c.bf16 %v466_v28, %v462_v27  ;;  %v1646_v41 = vpack.c.bf16 %v463_v33, %v459_v32  ;;  %v1918_v28 = vpack.c.bf16 %v497_v22, %v493_v20  ;;  %v544_v20 = vld [vmem:[#allocation7 + $0xe68] sm:$0xff]  ;;  %v546_v22 = vld [vmem:[#allocation7 + $0xe78] sm:$0xff] }
 0x11c   :  { %1881 = vmatprep.subr.bf16.mxu1 %v1880_v39  ;;  %v470_v39 = vld [vmem:[#allocation7 + $0xc18] sm:$0xff]  ;;  %v1902_v42 = vpack.c.bf16 %v465_v36, %v461_v34  ;;  %v501_v32 = vld [vmem:[#allocation7 + $0xd10] sm:$0xff]  ;;  %v1920_v33 = vpack.c.bf16 %v506_v26, %v502_v25  ;;  %v512_v36 = vld [vmem:[#allocation7 + $0xd68] sm:$0xff] }
 0x11d   :  { %v505_v34 = vld [vmem:[#allocation7 + $0xd30] sm:$0xff]  ;;  %v539_v26 = vld [vmem:[#allocation7 + $0xe40] sm:$0xff] }
 0x11e   :  { %1627 = vmatpush1.bf16.msra.mxu0 %v1626_v45  ;;  %v471_v45 = vld [vmem:[#allocation7 + $0xc20] sm:$0xff] }
 0x11f   :  { %1883 = vmatpush1.bf16.msra.mxu1 %v1882_v46  ;;  %1629 = vmatprep.subr.bf16.mxu0 %v1628_v47  ;;  %v469_v46 = vld [vmem:[#allocation7 + $0xc10] sm:$0xff]  ;;  %v1904_v47 = vpack.c.bf16 %v474_v40, %v470_v39  ;;  %v1650_v54 = vpack.c.bf16 %v471_v45, %v467_v44  ;;  %v1922_v40 = vpack.c.bf16 %v505_v34, %v501_v32  ;;  %v552_v32 = vld [vmem:[#allocation7 + $0xea8] sm:$0xff]  ;;  %v554_v34 = vld [vmem:[#allocation7 + $0xeb8] sm:$0xff] }
 0x120   :  { %1885 = vmatprep.subr.bf16.mxu1 %v1884_v51  ;;  %v478_v51 = vld [vmem:[#allocation7 + $0xc58] sm:$0xff]  ;;  %v1906_v55 = vpack.c.bf16 %v473_v48, %v469_v46  ;;  %v509_v44 = vld [vmem:[#allocation7 + $0xd50] sm:$0xff]  ;;  %v1924_v45 = vpack.c.bf16 %v514_v38, %v510_v37  ;;  %v520_v48 = vld [vmem:[#allocation7 + $0xda8] sm:$0xff] }
 0x121   :  { %v1908_v60 = vpack.c.bf16 %v482_v52, %v478_v51  ;;  %v513_v46 = vld [vmem:[#allocation7 + $0xd70] sm:$0xff]  ;;  %v547_v38 = vld [vmem:[#allocation7 + $0xe80] sm:$0xff] }
 0x122   :  { %1631 = vmatpush1.bf16.msra.mxu0 %v1630_v57  ;;  %v475_v57 = vld [vmem:[#allocation7 + $0xc40] sm:$0xff]  ;;  %v1926_v52 = vpack.c.bf16 %v513_v46, %v509_v44  ;;  %v560_v44 = vld [vmem:[#allocation7 + $0xee8] sm:$0xff]  ;;  %v562_v46 = vld [vmem:[#allocation7 + $0xef8] sm:$0xff] }
 0x123   :  { %1887 = vmatpush1.bf16.msra.mxu1 %v1886_v58  ;;  %1633 = vmatprep.subr.bf16.mxu0 %v1632_v59  ;;  %v479_v58 = vld [vmem:[#allocation7 + $0xc60] sm:$0xff]  ;;  %v477_v59 = vld [vmem:[#allocation7 + $0xc50] sm:$0xff] }
 0x124   :  { %1889 = vmatprep.subr.bf16.mxu1 %v1888_v63  ;;  %v488_v63 = vld [vmem:[#allocation7 + $0xca8] sm:$0xff]  ;;  %v1654_v3 = vpack.c.bf16 %v479_v58, %v475_v57  ;;  %v1910_v4 = vpack.c.bf16 %v481_v61, %v477_v59  ;;  %v1928_v57 = vpack.c.bf16 %v522_v50, %v518_v49  ;;  %v521_v58 = vld [vmem:[#allocation7 + $0xdb0] sm:$0xff]  ;;  %v526_v61 = vld [vmem:[#allocation7 + $0xdd8] sm:$0xff] }
 0x125   :  { %v524_v59 = vld [vmem:[#allocation7 + $0xdc8] sm:$0xff]  ;;  %v555_v50 = vld [vmem:[#allocation7 + $0xec0] sm:$0xff] }
 0x126   :  { %1635 = vmatpush1.bf16.msra.mxu0 %v1634_v5  ;;  %v1656_v5 = vpack.c.bf16 %v488_v63, %v484_v62  ;;  %v530_v62 = vld [vmem:[#allocation7 + $0xdf8] sm:$0xff] }
 0x127   :  { %1891 = vmatpush1.bf16.msra.mxu1 %v1890_v6  ;;  %1637 = vmatprep.subr.bf16.mxu0 %v1636_v7  ;;  %v483_v6 = vld [vmem:[#allocation7 + $0xc80] sm:$0xff] }
 0x128   :  { %1893 = vmatprep.subr.bf16.mxu1 %v1892_v11  ;;  %v487_v7 = vld [vmem:[#allocation7 + $0xca0] sm:$0xff]  ;;  %v492_v11 = vld [vmem:[#allocation7 + $0xcc8] sm:$0xff] }
 0x129   :  { %v1658_v15 = vpack.c.bf16 %v487_v7, %v483_v6  ;;  %v529_v6 = vld [vmem:[#allocation7 + $0xdf0] sm:$0xff]  ;;  %v532_v7 = vld [vmem:[#allocation7 + $0xe08] sm:$0xff] }
 0x12a   :  { %1639 = vmatpush1.bf16.msra.mxu0 %v1638_v17  ;;  %v1660_v17 = vpack.c.bf16 %v496_v12, %v492_v11  ;;  %v1680_v13 = vpack.c.bf16 %v536_v8, %v532_v7 }
 0x12b   :  { %1895 = vmatpush1.bf16.msra.mxu1 %v1894_v18  ;;  %1641 = vmatprep.subr.bf16.mxu0 %v1640_v19  ;;  %v491_v18 = vld [vmem:[#allocation7 + $0xcc0] sm:$0xff] }
 0x12c   :  { %1897 = vmatprep.subr.bf16.mxu1 %v1896_v23  ;;  %v495_v19 = vld [vmem:[#allocation7 + $0xce0] sm:$0xff]  ;;  %v500_v23 = vld [vmem:[#allocation7 + $0xd08] sm:$0xff] }
 0x12d   :  { %v1662_v27 = vpack.c.bf16 %v495_v19, %v491_v18  ;;  %v537_v18 = vld [vmem:[#allocation7 + $0xe30] sm:$0xff]  ;;  %v540_v19 = vld [vmem:[#allocation7 + $0xe48] sm:$0xff] }
 0x12e   :  { %1643 = vmatpush1.bf16.msra.mxu0 %v1642_v29  ;;  %v1664_v29 = vpack.c.bf16 %v504_v24, %v500_v23  ;;  %v1684_v25 = vpack.c.bf16 %v544_v20, %v540_v19 }
 0x12f   :  { %1899 = vmatpush1.bf16.msra.mxu1 %v1898_v30  ;;  %1645 = vmatprep.subr.bf16.mxu0 %v1644_v31  ;;  %v499_v30 = vld [vmem:[#allocation7 + $0xd00] sm:$0xff] }
 0x130   :  { %1901 = vmatprep.subr.bf16.mxu1 %v1900_v35  ;;  %v503_v31 = vld [vmem:[#allocation7 + $0xd20] sm:$0xff]  ;;  %v508_v35 = vld [vmem:[#allocation7 + $0xd48] sm:$0xff] }
 0x131   :  { %v1666_v39 = vpack.c.bf16 %v503_v31, %v499_v30  ;;  %v545_v30 = vld [vmem:[#allocation7 + $0xe70] sm:$0xff]  ;;  %v548_v31 = vld [vmem:[#allocation7 + $0xe88] sm:$0xff] }
 0x132   :  { %1647 = vmatpush1.bf16.msra.mxu0 %v1646_v41  ;;  %v1668_v41 = vpack.c.bf16 %v512_v36, %v508_v35  ;;  %v1688_v37 = vpack.c.bf16 %v552_v32, %v548_v31 }
 0x133   :  { %1903 = vmatpush1.bf16.msra.mxu1 %v1902_v42  ;;  %1649 = vmatprep.subr.bf16.mxu0 %v1648_v43  ;;  %v507_v42 = vld [vmem:[#allocation7 + $0xd40] sm:$0xff] }
 0x134   :  { %1905 = vmatprep.subr.bf16.mxu1 %v1904_v47  ;;  %v511_v43 = vld [vmem:[#allocation7 + $0xd60] sm:$0xff]  ;;  %v516_v47 = vld [vmem:[#allocation7 + $0xd88] sm:$0xff] }
 0x135   :  { %1009 = vmatmul.mubr.f32.vlgmr.msra.gmra.mrb[0].mxu0 %v79_v53  ;;  %v1670_v51 = vpack.c.bf16 %v511_v43, %v507_v42  ;;  %v553_v42 = vld [vmem:[#allocation7 + $0xeb0] sm:$0xff]  ;;  %v556_v43 = vld [vmem:[#allocation7 + $0xec8] sm:$0xff] }
 0x136   :  { %1651 = vmatpush1.bf16.msra.mxu0 %v1650_v54  ;;  %1293 = vmatmul.mubr.f32.vlgmr.msra.gmra.mrb[0].mxu1 %v79_v53  ;;  %v1672_v53 = vpack.c.bf16 %v520_v48, %v516_v47  ;;  %v515_v54 = vld [vmem:[#allocation7 + $0xd80] sm:$0xff]  ;;  %v1692_v49 = vpack.c.bf16 %v560_v44, %v556_v43 }
 0x137   :  { %1907 = vmatpush1.bf16.msra.mxu1 %v1906_v55  ;;  %1653 = vmatprep.subr.bf16.mxu0 %v1652_v56  ;;  %v519_v55 = vld [vmem:[#allocation7 + $0xda0] sm:$0xff]  ;;  %v517_v56 = vld [vmem:[#allocation7 + $0xd90] sm:$0xff] }
 0x138   :  { %1909 = vmatprep.subr.bf16.mxu1 %v1908_v60  ;;  %1079 = vmatprep.mubr.f32.mxu0 %v82_v2  ;;  %v528_v60 = vld [vmem:[#allocation7 + $0xde8] sm:$0xff]  ;;  %v1674_v63 = vpack.c.bf16 %v519_v55, %v515_v54  ;;  %v1930_v0 = vpack.c.bf16 %v521_v58, %v517_v56  ;;  %v561_v54 = vld [vmem:[#allocation7 + $0xef0] sm:$0xff]  ;;  %v570_v58 = vld [vmem:[#allocation7 + $0xf38] sm:$0xff] }
 0x139   :  { %1363 = vmatprep.mubr.f32.mxu1 %v82_v2  ;;  %v1676_v1 = vpack.c.bf16 %v528_v60, %v524_v59  ;;  %v523_v2 = vld [vmem:[#allocation7 + $0xdc0] sm:$0xff]  ;;  %v564_v55 = vld [vmem:[#allocation7 + $0xf08] sm:$0xff] }
 0x13a   :  { %1655 = vmatpush1.bf16.msra.mxu0 %v1654_v3  ;;  %v527_v3 = vld [vmem:[#allocation7 + $0xde0] sm:$0xff]  ;;  %v568_v56 = vld [vmem:[#allocation7 + $0xf28] sm:$0xff] }
 0x13b   :  { %1911 = vmatpush1.bf16.msra.mxu1 %v1910_v4  ;;  %1657 = vmatprep.subr.bf16.mxu0 %v1656_v5  ;;  %v525_v4 = vld [vmem:[#allocation7 + $0xdd0] sm:$0xff]  ;;  %v1932_v5 = vpack.c.bf16 %v530_v62, %v526_v61  ;;  %v1678_v11 = vpack.c.bf16 %v527_v3, %v523_v2  ;;  %v1696_v61 = vpack.c.bf16 %v568_v56, %v564_v55  ;;  %v563_v62 = vld [vmem:[#allocation7 + $0xf00] sm:$0xff]  ;;  %v572_v3 = vld [vmem:[#allocation7 + $0xf48] sm:$0xff] }
 0x13c   :  { %1913 = vmatprep.subr.bf16.mxu1 %v1912_v9  ;;  %v534_v9 = vld [vmem:[#allocation7 + $0xe18] sm:$0xff]  ;;  %v1934_v12 = vpack.c.bf16 %v529_v6, %v525_v4  ;;  %v569_v2 = vld [vmem:[#allocation7 + $0xf30] sm:$0xff]  ;;  %v576_v4 = vld [vmem:[#allocation7 + $0xf68] sm:$0xff] }
 0x13d   :  { %v578_v6 = vld [vmem:[#allocation7 + $0xf78] sm:$0xff] }
 0x13e   :  { %1659 = vmatpush1.bf16.msra.mxu0 %v1658_v15  ;;  %v535_v15 = vld [vmem:[#allocation7 + $0xe20] sm:$0xff] }
 0x13f   :  { %1915 = vmatpush1.bf16.msra.mxu1 %v1914_v16  ;;  %1661 = vmatprep.subr.bf16.mxu0 %v1660_v17  ;;  %v533_v16 = vld [vmem:[#allocation7 + $0xe10] sm:$0xff]  ;;  %v1936_v17 = vpack.c.bf16 %v538_v10, %v534_v9  ;;  %v1682_v23 = vpack.c.bf16 %v535_v15, %v531_v14  ;;  %v1700_v9 = vpack.c.bf16 %v576_v4, %v572_v3  ;;  %v571_v10 = vld [vmem:[#allocation7 + $0xf40] sm:$0xff]  ;;  %v580_v15 = vld [vmem:[#allocation7 + $0xf88] sm:$0xff] }
 0x140   :  { %1917 = vmatprep.subr.bf16.mxu1 %v1916_v21  ;;  %v542_v21 = vld [vmem:[#allocation7 + $0xe58] sm:$0xff]  ;;  %v1938_v24 = vpack.c.bf16 %v537_v18, %v533_v16  ;;  %v577_v14 = vld [vmem:[#allocation7 + $0xf70] sm:$0xff]  ;;  %v584_v16 = vld [vmem:[#allocation7 + $0xfa8] sm:$0xff] }
 0x141   :  { %v586_v18 = vld [vmem:[#allocation7 + $0xfb8] sm:$0xff] }
 0x142   :  { %1663 = vmatpush1.bf16.msra.mxu0 %v1662_v27  ;;  %v543_v27 = vld [vmem:[#allocation7 + $0xe60] sm:$0xff] }
 0x143   :  { %1919 = vmatpush1.bf16.msra.mxu1 %v1918_v28  ;;  %1665 = vmatprep.subr.bf16.mxu0 %v1664_v29  ;;  %v541_v28 = vld [vmem:[#allocation7 + $0xe50] sm:$0xff]  ;;  %v1940_v29 = vpack.c.bf16 %v546_v22, %v542_v21  ;;  %v1686_v35 = vpack.c.bf16 %v543_v27, %v539_v26  ;;  %v1704_v21 = vpack.c.bf16 %v584_v16, %v580_v15  ;;  %v579_v22 = vld [vmem:[#allocation7 + $0xf80] sm:$0xff]  ;;  %v588_v27 = vld [vmem:[#allocation7 + $0xfc8] sm:$0xff] }
 0x144   :  { %1921 = vmatprep.subr.bf16.mxu1 %v1920_v33  ;;  %v550_v33 = vld [vmem:[#allocation7 + $0xe98] sm:$0xff]  ;;  %v1942_v36 = vpack.c.bf16 %v545_v30, %v541_v28  ;;  %v585_v26 = vld [vmem:[#allocation7 + $0xfb0] sm:$0xff]  ;;  %v592_v28 = vld [vmem:[#allocation7 + $0xfe8] sm:$0xff] }
 0x145   :  { %v594_v30 = vld [vmem:[#allocation7 + $0xff8] sm:$0xff] }
 0x146   :  { %1667 = vmatpush1.bf16.msra.mxu0 %v1666_v39  ;;  %v551_v39 = vld [vmem:[#allocation7 + $0xea0] sm:$0xff] }
 0x147   :  { %1923 = vmatpush1.bf16.msra.mxu1 %v1922_v40  ;;  %1669 = vmatprep.subr.bf16.mxu0 %v1668_v41  ;;  %v549_v40 = vld [vmem:[#allocation7 + $0xe90] sm:$0xff]  ;;  %v1944_v41 = vpack.c.bf16 %v554_v34, %v550_v33  ;;  %v1690_v47 = vpack.c.bf16 %v551_v39, %v547_v38  ;;  %v1708_v33 = vpack.c.bf16 %v592_v28, %v588_v27  ;;  %v587_v34 = vld [vmem:[#allocation7 + $0xfc0] sm:$0xff] }
 0x148   :  { %1925 = vmatprep.subr.bf16.mxu1 %v1924_v45  ;;  %v558_v45 = vld [vmem:[#allocation7 + $0xed8] sm:$0xff]  ;;  %v1946_v48 = vpack.c.bf16 %v553_v42, %v549_v40  ;;  %v593_v38 = vld [vmem:[#allocation7 + $0xff0] sm:$0xff] }
 0x14a   :  { %1671 = vmatpush1.bf16.msra.mxu0 %v1670_v51  ;;  %v559_v51 = vld [vmem:[#allocation7 + $0xee0] sm:$0xff] }
 0x14b   :  { %1927 = vmatpush1.bf16.msra.mxu1 %v1926_v52  ;;  %1673 = vmatprep.subr.bf16.mxu0 %v1672_v53  ;;  %v557_v52 = vld [vmem:[#allocation7 + $0xed0] sm:$0xff]  ;;  %v1948_v53 = vpack.c.bf16 %v562_v46, %v558_v45  ;;  %v1694_v59 = vpack.c.bf16 %v559_v51, %v555_v50 }
 0x14c   :  { %1929 = vmatprep.subr.bf16.mxu1 %v1928_v57  ;;  %v566_v57 = vld [vmem:[#allocation7 + $0xf18] sm:$0xff]  ;;  %v1950_v60 = vpack.c.bf16 %v561_v54, %v557_v52 }
 0x14e   :  { %1675 = vmatpush1.bf16.msra.mxu0 %v1674_v63  ;;  %v567_v63 = vld [vmem:[#allocation7 + $0xf20] sm:$0xff] }
 0x14f   :  { %1931 = vmatpush1.bf16.msra.mxu1 %v1930_v0  ;;  %1677 = vmatprep.subr.bf16.mxu0 %v1676_v1  ;;  %v565_v0 = vld [vmem:[#allocation7 + $0xf10] sm:$0xff]  ;;  %v1952_v1 = vpack.c.bf16 %v570_v58, %v566_v57  ;;  %v1698_v7 = vpack.c.bf16 %v567_v63, %v563_v62 }
 0x150   :  { %1933 = vmatprep.subr.bf16.mxu1 %v1932_v5  ;;  %v574_v5 = vld [vmem:[#allocation7 + $0xf58] sm:$0xff]  ;;  %v1954_v8 = vpack.c.bf16 %v569_v2, %v565_v0 }
 0x152   :  { %1679 = vmatpush1.bf16.msra.mxu0 %v1678_v11  ;;  %v575_v11 = vld [vmem:[#allocation7 + $0xf60] sm:$0xff] }
 0x153   :  { %1935 = vmatpush1.bf16.msra.mxu1 %v1934_v12  ;;  %1681 = vmatprep.subr.bf16.mxu0 %v1680_v13  ;;  %v573_v12 = vld [vmem:[#allocation7 + $0xf50] sm:$0xff]  ;;  %v1956_v13 = vpack.c.bf16 %v578_v6, %v574_v5  ;;  %v1702_v19 = vpack.c.bf16 %v575_v11, %v571_v10 }
 0x154   :  { %1937 = vmatprep.subr.bf16.mxu1 %v1936_v17  ;;  %v582_v17 = vld [vmem:[#allocation7 + $0xf98] sm:$0xff]  ;;  %v1958_v20 = vpack.c.bf16 %v577_v14, %v573_v12 }
 0x156   :  { %1683 = vmatpush1.bf16.msra.mxu0 %v1682_v23  ;;  %v583_v23 = vld [vmem:[#allocation7 + $0xfa0] sm:$0xff] }
 0x157   :  { %1939 = vmatpush1.bf16.msra.mxu1 %v1938_v24  ;;  %1685 = vmatprep.subr.bf16.mxu0 %v1684_v25  ;;  %v581_v24 = vld [vmem:[#allocation7 + $0xf90] sm:$0xff]  ;;  %v1960_v25 = vpack.c.bf16 %v586_v18, %v582_v17  ;;  %v1706_v31 = vpack.c.bf16 %v583_v23, %v579_v22 }
 0x158   :  { %1941 = vmatprep.subr.bf16.mxu1 %v1940_v29  ;;  %v590_v29 = vld [vmem:[#allocation7 + $0xfd8] sm:$0xff]  ;;  %v1962_v32 = vpack.c.bf16 %v585_v26, %v581_v24 }
 0x15a   :  { %1687 = vmatpush1.bf16.msra.mxu0 %v1686_v35  ;;  %v591_v35 = vld [vmem:[#allocation7 + $0xfe0] sm:$0xff] }
 0x15b   :  { %1943 = vmatpush1.bf16.msra.mxu1 %v1942_v36  ;;  %1689 = vmatprep.subr.bf16.mxu0 %v1688_v37  ;;  %v1964_v36 = vpack.c.bf16 %v594_v30, %v590_v29  ;;  %v589_v37 = vld [vmem:[#allocation7 + $0xfd0] sm:$0xff]  ;;  %v1710_v39 = vpack.c.bf16 %v591_v35, %v587_v34 }
 0x15c   :  { %1945 = vmatprep.subr.bf16.mxu1 %v1944_v41  ;;  %v1966_v40 = vpack.c.bf16 %v593_v38, %v589_v37  ;;  %v81_v41 = vld [vmem:[#allocation2 + $0x30] sm:$0xff] }
 0x15e   :  { %1691 = vmatpush1.bf16.msra.mxu0 %v1690_v47 }
 0x15f   :  { %1947 = vmatpush1.bf16.msra.mxu1 %v1946_v48  ;;  %1693 = vmatprep.subr.bf16.mxu0 %v1692_v49 }
 0x160   :  { %1949 = vmatprep.subr.bf16.mxu1 %v1948_v53 }
 0x162   :  { %1695 = vmatpush1.bf16.msra.mxu0 %v1694_v59 }
 0x163   :  { %1951 = vmatpush1.bf16.msra.mxu1 %v1950_v60  ;;  %1697 = vmatprep.subr.bf16.mxu0 %v1696_v61 }
 0x164   :  { %1953 = vmatprep.subr.bf16.mxu1 %v1952_v1 }
 0x166   :  { %1699 = vmatpush1.bf16.msra.mxu0 %v1698_v7 }
 0x167   :  { %1955 = vmatpush1.bf16.msra.mxu1 %v1954_v8  ;;  %1701 = vmatprep.subr.bf16.mxu0 %v1700_v9 }
 0x168   :  { %1957 = vmatprep.subr.bf16.mxu1 %v1956_v13 }
 0x16a   :  { %1703 = vmatpush1.bf16.msra.mxu0 %v1702_v19 }
 0x16b   :  { %1959 = vmatpush1.bf16.msra.mxu1 %v1958_v20  ;;  %1705 = vmatprep.subr.bf16.mxu0 %v1704_v21 }
 0x16c   :  { %1961 = vmatprep.subr.bf16.mxu1 %v1960_v25 }
 0x16e   :  { %1707 = vmatpush1.bf16.msra.mxu0 %v1706_v31 }
 0x16f   :  { %1963 = vmatpush1.bf16.msra.mxu1 %v1962_v32  ;;  %1709 = vmatprep.subr.bf16.mxu0 %v1708_v33 }
 0x170   :  { %1965 = vmatprep.subr.bf16.mxu1 %v1964_v36 }
 0x172   :  { %1711 = vmatpush1.bf16.msra.mxu0 %v1710_v39 }
 0x173   :  { %1967 = vmatpush1.bf16.msra.mxu1 %v1966_v40 }
 0x175   :  { %1080 = vmatmul.mubr.f32.vlgmr.msra.gmra.mrb[0].mxu0 %v81_v41 }
 0x176   :  { %1364 = vmatmul.mubr.f32.vlgmr.msra.gmra.mrb[0].mxu1 %v81_v41 }
 0x248   :  { %v1081_v42 = vpop.f32.mrb[0].mxu0 }
 0x249   :  { %1370 = vst [vmem:[#allocation10] sm:$0xff] %v1081_v42  ;;  %v1365_v43 = vpop.f32.mrb[0].mxu1  ;;  %v1083_v44 = vpop.f32.mrb[1].mxu0 }
 0x24a   :  { %1372 = vst [vmem:[#allocation10 + $0x10] sm:$0xff] %v1365_v43  ;;  %1371 = vst [vmem:[#allocation10 + $0x8] sm:$0xff] %v1083_v44  ;;  %v1367_v45 = vpop.f32.mrb[1].mxu1 }
 0x24b   :  { %1373 = vst [vmem:[#allocation10 + $0x18] sm:$0xff] %v1367_v45 }
 0x24c   :  { %2094 = shalt.err (!%p2091_p0)
}
 0x24d   :  { %s2095_s18 = scalar_lea.hbm %s2213_s4, 512 }
 0x24e   :  { %p2096_p1 = scmp.ne.s32.totalorder %s2213_s4, %s2095_s18  ;;  %p2099_p2 = scmp.lt.u32.totalorder %s2095_s18, %s2213_s4 }
 0x250   :  { %p2101_p3 = pnand %p2099_p2, %p2096_p1 }
 0x252   :  { %2104 = shalt.err (!%p2101_p3)
}
 0x253   :  { %1383 = dma.vmem_to_hbm [thread:$0]  %s1381_s14, 512, %s2213_s4, [#allocation4]  }
 0x254   :  { %2111 = dma.done.wait [#allocation4], 512  }
 0x255   :  { %2112 = vsyncadd [#allocation4], 4294966784 }
 0x256   :  { %1387 = vsyncpa [#allocation3], 1 }
 0x257   :  { %1388 = vsyncpa [#allocation6], 1 }
 0x258   :  { %1389 = vsyncpa [#allocation9], 1 }
 0x259   :  { %1390 = vsyncpa [#allocation4], 1 }

</bundles_post_ra>
